<compile_context>
chip_gen: v7x
topology: tpu7x:2x2x1
jax: 0.10.0
libtpu: 0.0.40
codegen_flags: <defaults>
</compile_context>

<pallas_src>
import math

import jax
import jax.numpy as jnp
import numpy as np
from jax.experimental import pallas as pl
from jax.experimental.pallas import tpu as pltpu


# ----------------------------------------------------------------------------
# Static planning: conv geometry.
# ----------------------------------------------------------------------------
def _conv_out(size, k, s):
    return (size - k) // s + 1


def build_plan(input_shape, cnn_features):
    c, h, w = input_shape
    layers = []
    for cfg in cnn_features:
        assert cfg["in_channels"] == c
        k, s = cfg["kernel_size"], cfg["stride"]
        oh, ow = _conv_out(h, k, s), _conv_out(w, k, s)
        layers.append(dict(cin=c, cout=cfg["out_channels"], kh=k, kw=k,
                           stride=s, h_in=h, w_in=w, oh=oh, ow=ow,
                           hw_in=h * w, p_out=oh * ow))
        c, h, w = cfg["out_channels"], oh, ow
    return {"input_shape": input_shape, "layers": layers,
            "flat_size": c * h * w}


# ----------------------------------------------------------------------------
# Parameters (PyTorch layout).
# ----------------------------------------------------------------------------
def init_params(key, plan, feature_dim):
    """Conv2d: (Cout, Cin, kh, kw) + (Cout,);  Linear: (F, flat) + (F,)."""
    params = {"conv": []}
    for lp in plan["layers"]:
        key, k_w, k_b = jax.random.split(key, 3)
        bound = 1.0 / math.sqrt(lp["cin"] * lp["kh"] * lp["kw"])
        wgt = jax.random.uniform(k_w, (lp["cout"], lp["cin"], lp["kh"], lp["kw"]),
                                 jnp.float32, -bound, bound)
        bias = jax.random.uniform(k_b, (lp["cout"],), jnp.float32, -bound, bound)
        params["conv"].append({"w": wgt, "b": bias, "stride": lp["stride"]})
    key, k_w, k_b = jax.random.split(key, 3)
    bound = 1.0 / math.sqrt(plan["flat_size"])
    params["fc_w"] = jax.random.uniform(k_w, (feature_dim, plan["flat_size"]),
                                        jnp.float32, -bound, bound)
    params["fc_b"] = jax.random.uniform(k_b, (feature_dim,), jnp.float32,
                                        -bound, bound)
    return params


# ----------------------------------------------------------------------------
# Init-time packing: fold the conv (im2col gather + channel mix) into one
# effective matrix per layer, pad output widths to multiples of 128 lanes.
# ----------------------------------------------------------------------------
def _round_up(x, m):
    return (x + m - 1) // m * m


def pack_params(params, plan):
    cin0, h0, w0 = plan["input_shape"]
    d_in = cin0 * h0 * w0                     # raw input flatten order (C,H,W)
    packed = {"mats": [], "biases": []}
    for lp, layer in zip(plan["layers"], params["conv"]):
        cin, cout, k, s = lp["cin"], lp["cout"], lp["kh"], lp["stride"]
        w_in, oh, ow = lp["w_in"], lp["oh"], lp["ow"]
        hw_in, p_out = lp["hw_in"], lp["p_out"]
        d_out = cout * p_out
        d_out_pad = _round_up(d_out, 128)     # lane-dense layer output

        w_np = np.asarray(layer["w"], np.float32)           # (cout,cin,kh,kw)
        m = np.zeros((d_in, d_out_pad), np.float32)
        ci_rows = np.arange(cin) * hw_in
        co_cols = np.arange(cout) * p_out
        for i in range(k):
            for j in range(k):
                tap = w_np[:, :, i, j].T                    # (cin, cout)
                for ph in range(oh):
                    for pw in range(ow):
                        q = (s * ph + i) * w_in + (s * pw + j)
                        p = ph * ow + pw
                        m[np.ix_(ci_rows + q, co_cols + p)] = tap

        bias = np.zeros((1, d_out_pad), np.float32)
        bias[0, :d_out] = np.repeat(np.asarray(layer["b"], np.float32), p_out)

        packed["mats"].append(jnp.asarray(m, jnp.bfloat16))
        packed["biases"].append(jnp.asarray(bias, jnp.float32))
        d_in = d_out_pad                      # padded rows of next matrix = 0

    flat = plan["flat_size"]
    feat = params["fc_b"].shape[0]
    wfc = np.zeros((d_in, feat), np.float32)
    wfc[:flat, :] = np.asarray(params["fc_w"], np.float32).T
    packed["wfc"] = jnp.asarray(wfc, jnp.bfloat16)
    packed["bfc"] = jnp.asarray(params["fc_b"], np.float32).reshape(1, feat)
    return packed


# ----------------------------------------------------------------------------
# Fused Pallas kernel: per grid step, one batch tile flows through
# n_layers + 1 GEMMs entirely in VMEM/vregs.
# ----------------------------------------------------------------------------
def _make_kernel(n_layers):
    def kernel(*refs):
        x_ref = refs[0]
        wfc_ref = refs[1 + 2 * n_layers]
        bfc_ref = refs[2 + 2 * n_layers]
        out_ref = refs[3 + 2 * n_layers]

        act = x_ref[...].astype(jnp.bfloat16)               # (B_TILE, d0)
        for li in range(n_layers):
            m_ref = refs[1 + 2 * li]
            b_ref = refs[2 + 2 * li]
            h = jnp.dot(act, m_ref[...],                    # one GEMM == conv
                        preferred_element_type=jnp.float32)
            h = jnp.maximum(h + b_ref[...], 0.0)            # f32 epilogue
            act = h.astype(jnp.bfloat16)

        h = jnp.dot(act, wfc_ref[...],                      # fc head, one GEMM
                    preferred_element_type=jnp.float32)
        out_ref[...] = jnp.maximum(h + bfc_ref[...], 0.0)
    return kernel


def _pick_b_tile(n):
    """Sublane-dense batch tile; >= 2 grid steps when the batch allows so both
    v7x TensorCores get work under dimension_semantics=('parallel',)."""
    if n <= 8:
        return 8
    target = (n + 1) // 2
    t = 8
    while t < target and t < 128:
        t *= 2
    return t


def make_forward(plan):
    n_layers = len(plan["layers"])
    cin0, h0, w0 = plan["input_shape"]
    d0 = cin0 * h0 * w0
    kernel = _make_kernel(n_layers)

    @jax.jit
    def forward(packed, x):                                 # x: (N, C, H, W) f32
        n = x.shape[0]
        feat = packed["bfc"].shape[-1]
        b_tile = _pick_b_tile(n)
        n_pad = pl.cdiv(n, b_tile) * b_tile

        x_flat = x.reshape(n, d0)                           # view, free
        if n_pad != n:
            x_flat = jnp.pad(x_flat, ((0, n_pad - n), (0, 0)))

        in_specs = [pl.BlockSpec((b_tile, d0), lambda b: (b, 0))]
        operands = [x_flat]
        for li in range(n_layers):
            m, bias = packed["mats"][li], packed["biases"][li]
            in_specs += [pl.BlockSpec(m.shape, lambda b: (0, 0)),    # resident
                         pl.BlockSpec(bias.shape, lambda b: (0, 0))]
            operands += [m, bias]
        in_specs += [pl.BlockSpec(packed["wfc"].shape, lambda b: (0, 0)),
                     pl.BlockSpec(packed["bfc"].shape, lambda b: (0, 0))]
        operands += [packed["wfc"], packed["bfc"]]

        out = pl.pallas_call(
            kernel,
            out_shape=jax.ShapeDtypeStruct((n_pad, feat), jnp.float32),
            grid_spec=pltpu.PrefetchScalarGridSpec(
                num_scalar_prefetch=0,
                grid=(n_pad // b_tile,),
                in_specs=in_specs,
                out_specs=pl.BlockSpec((b_tile, feat), lambda b: (b, 0)),
            ),
            compiler_params=pltpu.CompilerParams(
                dimension_semantics=("parallel",),
            ),
        )(*operands)
        return out[:n]

    return forward


# ----------------------------------------------------------------------------
# Plain-JAX reference mirroring the PyTorch module (bf16 matmul operands,
# f32 accumulation) to validate the fused kernel.
# ----------------------------------------------------------------------------
def reference_forward(params, x):
    a = x.astype(jnp.float32)
    for layer in params["conv"]:
        wgt, bias, s = layer["w"], layer["b"], layer["stride"]
        cout, cin, kh, kw = wgt.shape
        n, c, hh, ww = a.shape
        oh, ow = _conv_out(hh, kh, s), _conv_out(ww, kw, s)
        cols = []
        for i in range(kh):
            for j in range(kw):
                cols.append(a[:, :, i:i + s * oh:s, j:j + s * ow:s])
        patches = jnp.stack(cols, axis=2).reshape(n, c * kh * kw, oh * ow)
        pre = jnp.einsum("ok,nkp->nop",
                         wgt.reshape(cout, cin * kh * kw).astype(jnp.bfloat16),
                         patches.astype(jnp.bfloat16),
                         preferred_element_type=jnp.float32)
        a = jnp.maximum(pre + bias[None, :, None], 0.0).reshape(n, cout, oh, ow)
    flat = a.reshape(a.shape[0], -1)                        # PyTorch view(N, -1)
    pre = jnp.dot(flat.astype(jnp.bfloat16),
                  params["fc_w"].T.astype(jnp.bfloat16),
                  preferred_element_type=jnp.float32) + params["fc_b"]
    return jnp.maximum(pre, 0.0)


# ----------------------------------------------------------------------------
if __name__ == "__main__":
    input_shape = (4, 16, 16)          # (channels, height, width)
    feature_dim = 32
    cnn_features = [
        {"in_channels": 4, "out_channels": 8, "kernel_size": 3, "stride": 2},
        {"in_channels": 8, "out_channels": 16, "kernel_size": 3, "stride": 2},
    ]
    batch = 2

    plan = build_plan(input_shape, cnn_features)
    key = jax.random.PRNGKey(0)
    key, p_key, x_key = jax.random.split(key, 3)
    params = init_params(p_key, plan, feature_dim)
    packed = pack_params(params, plan)
    forward = make_forward(plan)

    x = jax.random.normal(x_key, (batch, *input_shape), jnp.float32)   # NCHW

    out = jax.block_until_ready(forward(packed, x))
    assert out.shape == (batch, feature_dim), out.shape
    assert bool(jnp.all(out >= 0.0))                       # ReLU head

    ref = jax.block_until_ready(reference_forward(params, x))
    max_err = float(jnp.max(jnp.abs(out - ref)))
    assert max_err < 1e-2, f"mismatch vs reference: {max_err}"
    print("KERNEL_OK")
</pallas_src>

<mosaic_0001>
module attributes {stable_mosaic.version = 11 : i64} {
  func.func @kernel(%arg0: i32, %arg1: memref<8x1024xf32, #tpu.memory_space<vmem>>, %arg2: memref<1024x512xbf16, #tpu.memory_space<vmem>>, %arg3: memref<1x512xf32, #tpu.memory_space<vmem>>, %arg4: memref<512x256xbf16, #tpu.memory_space<vmem>>, %arg5: memref<1x256xf32, #tpu.memory_space<vmem>>, %arg6: memref<256x32xbf16, #tpu.memory_space<vmem>>, %arg7: memref<1x32xf32, #tpu.memory_space<vmem>>, %arg8: memref<8x32xf32, #tpu.memory_space<vmem>>) attributes {dimension_semantics = [#tpu.dimension_semantics<parallel>], iteration_bounds = array<i64: 1>, scalar_prefetch = 0 : i64, scratch_operands = 0 : i64, tpu.core_type = #tpu.core_type<tc>, window_params = [{transform_indices = @transform_0, window_bounds = array<i64: 8, 1024>}, {pipeline_mode = #tpu.pipeline_mode<synchronous>, transform_indices = @transform_1, window_bounds = array<i64: 1024, 512>}, {pipeline_mode = #tpu.pipeline_mode<synchronous>, transform_indices = @transform_2, window_bounds = array<i64: 1, 512>}, {pipeline_mode = #tpu.pipeline_mode<synchronous>, transform_indices = @transform_3, window_bounds = array<i64: 512, 256>}, {pipeline_mode = #tpu.pipeline_mode<synchronous>, transform_indices = @transform_4, window_bounds = array<i64: 1, 256>}, {pipeline_mode = #tpu.pipeline_mode<synchronous>, transform_indices = @transform_5, window_bounds = array<i64: 256, 32>}, {pipeline_mode = #tpu.pipeline_mode<synchronous>, transform_indices = @transform_6, window_bounds = array<i64: 1, 32>}, {transform_indices = @transform_7, window_bounds = array<i64: 8, 32>}]} {
    %c0 = arith.constant 0 : index
    %c0_0 = arith.constant 0 : index
    %0 = vector.load %arg1[%c0, %c0_0] : memref<8x1024xf32, #tpu.memory_space<vmem>>, vector<8x1024xf32>
    %1 = arith.truncf %0 : vector<8x1024xf32> to vector<8x1024xbf16>
    %c0_1 = arith.constant 0 : index
    %c0_2 = arith.constant 0 : index
    %2 = vector.load %arg2[%c0_1, %c0_2] : memref<1024x512xbf16, #tpu.memory_space<vmem>>, vector<1024x512xbf16>
    %cst = arith.constant dense<0.000000e+00> : vector<8x512xf32>
    %3 = tpu.matmul %1, %2, %cst {dimension_numbers = #tpu.dot_dimension_numbers<[1], [0], [0], [1], [0, 0, 1, 1], [], []>} : vector<8x1024xbf16>, vector<1024x512xbf16>, vector<8x512xf32> -> vector<8x512xf32>
    %c0_3 = arith.constant 0 : index
    %c0_4 = arith.constant 0 : index
    %4 = vector.load %arg3[%c0_3, %c0_4] : memref<1x512xf32, #tpu.memory_space<vmem>>, vector<1x512xf32>
    %5 = vector.broadcast %4 : vector<1x512xf32> to vector<8x512xf32>
    %6 = arith.addf %3, %5 : vector<8x512xf32>
    %cst_5 = arith.constant 0.000000e+00 : f32
    %7 = vector.broadcast %cst_5 : f32 to vector<8x512xf32>
    %8 = arith.maximumf %6, %7 : vector<8x512xf32>
    %9 = arith.truncf %8 : vector<8x512xf32> to vector<8x512xbf16>
    %c0_6 = arith.constant 0 : index
    %c0_7 = arith.constant 0 : index
    %10 = vector.load %arg4[%c0_6, %c0_7] : memref<512x256xbf16, #tpu.memory_space<vmem>>, vector<512x256xbf16>
    %cst_8 = arith.constant dense<0.000000e+00> : vector<8x256xf32>
    %11 = tpu.matmul %9, %10, %cst_8 {dimension_numbers = #tpu.dot_dimension_numbers<[1], [0], [0], [1], [0, 0, 1, 1], [], []>} : vector<8x512xbf16>, vector<512x256xbf16>, vector<8x256xf32> -> vector<8x256xf32>
    %c0_9 = arith.constant 0 : index
    %c0_10 = arith.constant 0 : index
    %12 = vector.load %arg5[%c0_9, %c0_10] : memref<1x256xf32, #tpu.memory_space<vmem>>, vector<1x256xf32>
    %13 = vector.broadcast %12 : vector<1x256xf32> to vector<8x256xf32>
    %14 = arith.addf %11, %13 : vector<8x256xf32>
    %cst_11 = arith.constant 0.000000e+00 : f32
    %15 = vector.broadcast %cst_11 : f32 to vector<8x256xf32>
    %16 = arith.maximumf %14, %15 : vector<8x256xf32>
    %17 = arith.truncf %16 : vector<8x256xf32> to vector<8x256xbf16>
    %c0_12 = arith.constant 0 : index
    %c0_13 = arith.constant 0 : index
    %18 = vector.load %arg6[%c0_12, %c0_13] : memref<256x32xbf16, #tpu.memory_space<vmem>>, vector<256x32xbf16>
    %cst_14 = arith.constant dense<0.000000e+00> : vector<8x32xf32>
    %19 = tpu.matmul %17, %18, %cst_14 {dimension_numbers = #tpu.dot_dimension_numbers<[1], [0], [0], [1], [0, 0, 1, 1], [], []>} : vector<8x256xbf16>, vector<256x32xbf16>, vector<8x32xf32> -> vector<8x32xf32>
    %c0_15 = arith.constant 0 : index
    %c0_16 = arith.constant 0 : index
    %20 = vector.load %arg7[%c0_15, %c0_16] : memref<1x32xf32, #tpu.memory_space<vmem>>, vector<1x32xf32>
    %21 = vector.broadcast %20 : vector<1x32xf32> to vector<8x32xf32>
    %22 = arith.addf %19, %21 : vector<8x32xf32>
    %cst_17 = arith.constant 0.000000e+00 : f32
    %23 = vector.broadcast %cst_17 : f32 to vector<8x32xf32>
    %24 = arith.maximumf %22, %23 : vector<8x32xf32>
    %c0_18 = arith.constant 0 : index
    %c0_19 = arith.constant 0 : index
    %25 = vector.load %arg8[%c0_18, %c0_19] : memref<8x32xf32, #tpu.memory_space<vmem>>, vector<8x32xf32>
    tpu.vector_store %arg8[%c0_18, %c0_19], %24 {strides = array<i32>} : memref<8x32xf32, #tpu.memory_space<vmem>>, vector<8x32xf32>,
    return
  }
  func.func @transform_0(%arg0: i32) -> (i32, i32) {
    %c0_i32 = arith.constant 0 : i32
    %c0_i32_0 = arith.constant 0 : i32
    return %arg0, %c0_i32 : i32, i32
  }
  func.func @transform_1(%arg0: i32) -> (i32, i32) {
    %c0_i32 = arith.constant 0 : i32
    %c0_i32_0 = arith.constant 0 : i32
    %c0_i32_1 = arith.constant 0 : i32
    return %c0_i32, %c0_i32_0 : i32, i32
  }
  func.func @transform_2(%arg0: i32) -> (i32, i32) {
    %c0_i32 = arith.constant 0 : i32
    %c0_i32_0 = arith.constant 0 : i32
    %c0_i32_1 = arith.constant 0 : i32
    return %c0_i32, %c0_i32_0 : i32, i32
  }
  func.func @transform_3(%arg0: i32) -> (i32, i32) {
    %c0_i32 = arith.constant 0 : i32
    %c0_i32_0 = arith.constant 0 : i32
    %c0_i32_1 = arith.constant 0 : i32
    return %c0_i32, %c0_i32_0 : i32, i32
  }
  func.func @transform_4(%arg0: i32) -> (i32, i32) {
    %c0_i32 = arith.constant 0 : i32
    %c0_i32_0 = arith.constant 0 : i32
    %c0_i32_1 = arith.constant 0 : i32
    return %c0_i32, %c0_i32_0 : i32, i32
  }
  func.func @transform_5(%arg0: i32) -> (i32, i32) {
    %c0_i32 = arith.constant 0 : i32
    %c0_i32_0 = arith.constant 0 : i32
    %c0_i32_1 = arith.constant 0 : i32
    return %c0_i32, %c0_i32_0 : i32, i32
  }
  func.func @transform_6(%arg0: i32) -> (i32, i32) {
    %c0_i32 = arith.constant 0 : i32
    %c0_i32_0 = arith.constant 0 : i32
    %c0_i32_1 = arith.constant 0 : i32
    return %c0_i32, %c0_i32_0 : i32, i32
  }
  func.func @transform_7(%arg0: i32) -> (i32, i32) {
    %c0_i32 = arith.constant 0 : i32
    %c0_i32_0 = arith.constant 0 : i32
    return %arg0, %c0_i32 : i32, i32
  }
}

</mosaic_0001>

<bundles_post_ra>
// kernel: forward.1
= control target key start
LH: loop header
LB: loop body
LE: loop exit
PB: predicated region body
PF: predicated region fallthrough
CT: control target
= control target key end

     0   :  { %12 = vsyncpa [#allocation3], 0  ;;  %s3778_s0 = inlined_call_operand.vmem [shape: f32[8,1024], index: 0, kind: input, shape index: {}]   ;;  %s3779_s1 = inlined_call_operand.hbm [shape: bf16[1024,512], index: 1, kind: input, shape index: {}]   ;;  %s3780_s2 = inlined_call_operand.vmem [shape: f32[1,512], index: 2, kind: input, shape index: {}]   ;;  %s3781_s3 = inlined_call_operand.hbm [shape: bf16[512,256], index: 3, kind: input, shape index: {}]   ;;  %s3782_s4 = inlined_call_operand.vmem [shape: f32[1,256], index: 4, kind: input, shape index: {}]   ;;  %s3783_s5 = inlined_call_operand.vmem [shape: bf16[256,32], index: 5, kind: input, shape index: {}]   ;;  %s3784_s6 = inlined_call_operand.vmem [shape: f32[1,32], index: 6, kind: input, shape index: {}]   ;;  %s3785_s7 = inlined_call_operand.vmem [shape: f32[8,32], index: 7, kind: output, shape index: {}]  }
   0x1   :  { %13 = vsyncpa [#allocation5], 0  ;;  %s3572_s24 = smov [#allocation2]   ;;  %s3524_s28 = scalar_lea.hbm %s3779_s1, 32768 }
   0x2   :  { %s21_s25 = sshll.u32 %s3572_s24, 4  ;;  %p3525_p0 = scmp.ne.s32.totalorder %s3779_s1, %s3524_s28  ;;  %s22_s25 = int_to_ptr.vmem [resolvable:$true] %s21_s25 }
   0x3   :  { %p3528_p1 = scmp.lt.u32.totalorder %s3524_s28, %s3779_s1 }
   0x5   :  { %p3530_p2 = pnand %p3528_p1, %p3525_p0 }
   0x7   :  { %3533 = shalt.err (!%p3530_p2)
}
   0x8   :  { %s3534_s10 = scalar_lea.vmem %s22_s25, 32768  ;;  %p3539_p4 = scmp.lt.s32.totalorder %s22_s25, %s22_s25 }
   0x9   :  { %p3535_p3 = scmp.ne.s32.totalorder %s22_s25, %s3534_s10  ;;  %p3540_p5 = scmp.lt.s32.totalorder %s3534_s10, %s3534_s10 }
   0xb   :  { %p3541_p6 = por %p3540_p5, %p3539_p4 }
   0xd   :  { %p3542_p7 = pnand %p3541_p6, %p3535_p3 }
   0xf   :  { %3545 = shalt.err (!%p3542_p7)
}
  0x10   :  { %s3573_s11 = smov 256   ;;  %s3574_s12 = smov 16  }
  0x11   :  { %27 = dma.hbm_to_vmem [thread:$0]  %s3779_s1, 32768, %s22_s25, [#allocation3], %s3573_s11, %s3573_s11, %s3574_s12  }
  0x12   :  { %s3575_s15 = smov [#allocation4]   ;;  %s3546_s19 = scalar_lea.hbm %s3781_s3, 8192 }
  0x13   :  { %s35_s16 = sshll.u32 %s3575_s15, 4  ;;  %p3547_p8 = scmp.ne.s32.totalorder %s3781_s3, %s3546_s19  ;;  %s36_s16 = int_to_ptr.vmem [resolvable:$true] %s35_s16 }
  0x14   :  { %p3550_p9 = scmp.lt.u32.totalorder %s3546_s19, %s3781_s3 }
  0x16   :  { %p3552_p10 = pnand %p3550_p9, %p3547_p8 }
  0x18   :  { %3555 = shalt.err (!%p3552_p10)
}
  0x19   :  { %s3556_s24 = scalar_lea.vmem %s36_s16, 8192  ;;  %p3561_p12 = scmp.lt.s32.totalorder %s36_s16, %s36_s16 }
  0x1a   :  { %p3557_p11 = scmp.ne.s32.totalorder %s36_s16, %s3556_s24  ;;  %p3562_p13 = scmp.lt.s32.totalorder %s3556_s24, %s3556_s24 }
  0x1c   :  { %p3563_p0 = por %p3562_p13, %p3561_p12 }
  0x1e   :  { %p3564_p1 = pnand %p3563_p0, %p3557_p11 }
  0x20   :  { %3567 = shalt.err (!%p3564_p1)
}
  0x21   :  { %s3576_s1 = smov 128   ;;  %s3577_s25 = smov 8  }
  0x22   :  { %41 = dma.hbm_to_vmem [thread:$0]  %s3781_s3, 8192, %s36_s16, [#allocation5], %s3576_s1, %s3576_s1, %s3577_s25  }
  0x23   :  { %3568 = dma.done.wait [#allocation3], 32768  }
  0x24   :  { %3569 = vsyncadd [#allocation3], 4294934528 }
  0x25   :  { %3570 = dma.done.wait [#allocation5], 8192  }
  0x26   :  { %3571 = vsyncadd [#allocation5], 4294959104  ;;  %v3028_v0 = vld [vmem:[#allocation2 + $0x4] ss:$16 sps:$4 sm:$0xff]   ;;  %v3032_v2 = vld [vmem:[#allocation2] ss:$16 sps:$4 sm:$0xff]  }
  0x27   :  { %v3030_v1 = vld [vmem:[#allocation2 + $0x204] ss:$16 sps:$4 sm:$0xff]   ;;  %1629 = vmatprep.subr.bf16.mxu1 %v3028_v0  ;;  %v3033_v3 = vld [vmem:[#allocation2 + $0x200] ss:$16 sps:$4 sm:$0xff]   ;;  %v56_v46 = vld [vmem:[%s3778_s0 + $0x8] sm:$0xff]  ;;  %vm2623_vm0 = vcmask 261120  }
  0x28   :  { %1670 = vmatprep.subr.bf16.mxu0 %v3030_v1  ;;  %v3034_v4 = vld [vmem:[#allocation2 + $0x24] ss:$16 sps:$4 sm:$0xff]   ;;  %1630 = vmatpush1.bf16.msra.mxu1 %v3032_v2  ;;  %v3038_v6 = vld [vmem:[#allocation2 + $0x20] ss:$16 sps:$4 sm:$0xff]   ;;  %v3645_v48 = vpack.c.bf16 %v56_v46, %v56_v46  ;;  %v58_v49 = vld [vmem:[%s3778_s0 + $0x18] sm:$0xff] }
  0x29   :  { %1671 = vmatpush1.bf16.msra.mxu0 %v3033_v3  ;;  %v3036_v5 = vld [vmem:[#allocation2 + $0x224] ss:$16 sps:$4 sm:$0xff]   ;;  %1631 = vmatprep.subr.bf16.mxu1 %v3034_v4  ;;  %v3039_v7 = vld [vmem:[#allocation2 + $0x220] ss:$16 sps:$4 sm:$0xff]   ;;  %v3650_v52 = vpack.c.bf16 %v58_v49, %v58_v49  ;;  %v3181_v49 = vld [vmem:[#allocation2 + $0x128] ss:$16 sps:$4 sm:$0xff]  }
  0x2a   :  { %1672 = vmatprep.subr.bf16.mxu0 %v3036_v5  ;;  %v3040_v8 = vld [vmem:[#allocation2 + $0x44] ss:$16 sps:$4 sm:$0xff]   ;;  %v3044_v10 = vld [vmem:[#allocation2 + $0x40] ss:$16 sps:$4 sm:$0xff]   ;;  %1661 = vmatprep.mubr.bf16.mxu1 %v3645_v48 }
  0x2b   :  { %v3042_v9 = vld [vmem:[#allocation2 + $0x244] ss:$16 sps:$4 sm:$0xff]   ;;  %v3045_v11 = vld [vmem:[#allocation2 + $0x240] ss:$16 sps:$4 sm:$0xff]   ;;  %1702 = vmatprep.mubr.bf16.mxu0 %v3650_v52 }
  0x2c   :  { %1632 = vmatpush1.bf16.msra.mxu1 %v3038_v6  ;;  %v3046_v12 = vld [vmem:[#allocation2 + $0x64] ss:$16 sps:$4 sm:$0xff]   ;;  %v3050_v14 = vld [vmem:[#allocation2 + $0x60] ss:$16 sps:$4 sm:$0xff]  }
  0x2d   :  { %1673 = vmatpush1.bf16.msra.mxu0 %v3039_v7  ;;  %1633 = vmatprep.subr.bf16.mxu1 %v3040_v8  ;;  %v3048_v13 = vld [vmem:[#allocation2 + $0x264] ss:$16 sps:$4 sm:$0xff]   ;;  %v3051_v15 = vld [vmem:[#allocation2 + $0x260] ss:$16 sps:$4 sm:$0xff]   ;;  %v3129_v7 = vld [vmem:[#allocation2 + $0xc] ss:$16 sps:$4 sm:$0xff]  }
  0x2e   :  { %1674 = vmatprep.subr.bf16.mxu0 %v3042_v9  ;;  %v3052_v16 = vld [vmem:[#allocation2 + $0x84] ss:$16 sps:$4 sm:$0xff]   ;;  %v3056_v18 = vld [vmem:[#allocation2 + $0x80] ss:$16 sps:$4 sm:$0xff]  }
  0x2f   :  { %v3054_v17 = vld [vmem:[#allocation2 + $0x284] ss:$16 sps:$4 sm:$0xff]   ;;  %v3057_v19 = vld [vmem:[#allocation2 + $0x280] ss:$16 sps:$4 sm:$0xff]  }
  0x30   :  { %1634 = vmatpush1.bf16.msra.mxu1 %v3044_v10  ;;  %v3058_v20 = vld [vmem:[#allocation2 + $0xa4] ss:$16 sps:$4 sm:$0xff]   ;;  %v3062_v22 = vld [vmem:[#allocation2 + $0xa0] ss:$16 sps:$4 sm:$0xff]   ;;  %v3127_v10 = vld [vmem:[#allocation2 + $0x8] ss:$16 sps:$4 sm:$0xff]  }
  0x31   :  { %1675 = vmatpush1.bf16.msra.mxu0 %v3045_v11  ;;  %1635 = vmatprep.subr.bf16.mxu1 %v3046_v12  ;;  %v3060_v21 = vld [vmem:[#allocation2 + $0x2a4] ss:$16 sps:$4 sm:$0xff]   ;;  %v3063_v23 = vld [vmem:[#allocation2 + $0x2a0] ss:$16 sps:$4 sm:$0xff]  }
  0x32   :  { %1676 = vmatprep.subr.bf16.mxu0 %v3048_v13  ;;  %v3064_v24 = vld [vmem:[#allocation2 + $0xc4] ss:$16 sps:$4 sm:$0xff]   ;;  %v3068_v26 = vld [vmem:[#allocation2 + $0xc0] ss:$16 sps:$4 sm:$0xff]   ;;  %v3135_v13 = vld [vmem:[#allocation2 + $0x2c] ss:$16 sps:$4 sm:$0xff]  }
  0x33   :  { %v3066_v25 = vld [vmem:[#allocation2 + $0x2c4] ss:$16 sps:$4 sm:$0xff]   ;;  %v3069_v27 = vld [vmem:[#allocation2 + $0x2c0] ss:$16 sps:$4 sm:$0xff]  }
  0x34   :  { %1636 = vmatpush1.bf16.msra.mxu1 %v3050_v14  ;;  %v3070_v28 = vld [vmem:[#allocation2 + $0xe4] ss:$16 sps:$4 sm:$0xff]   ;;  %v3074_v30 = vld [vmem:[#allocation2 + $0xe0] ss:$16 sps:$4 sm:$0xff]  }
  0x35   :  { %1677 = vmatpush1.bf16.msra.mxu0 %v3051_v15  ;;  %1637 = vmatprep.subr.bf16.mxu1 %v3052_v16  ;;  %v3072_v29 = vld [vmem:[#allocation2 + $0x2e4] ss:$16 sps:$4 sm:$0xff]   ;;  %v3075_v31 = vld [vmem:[#allocation2 + $0x2e0] ss:$16 sps:$4 sm:$0xff]   ;;  %v3133_v15 = vld [vmem:[#allocation2 + $0x28] ss:$16 sps:$4 sm:$0xff]  }
  0x36   :  { %1678 = vmatprep.subr.bf16.mxu0 %v3054_v17  ;;  %v3076_v32 = vld [vmem:[#allocation2 + $0x104] ss:$16 sps:$4 sm:$0xff]   ;;  %v3080_v34 = vld [vmem:[#allocation2 + $0x100] ss:$16 sps:$4 sm:$0xff]   ;;  %v3141_v17 = vld [vmem:[#allocation2 + $0x4c] ss:$16 sps:$4 sm:$0xff]  }
  0x37   :  { %v3078_v33 = vld [vmem:[#allocation2 + $0x304] ss:$16 sps:$4 sm:$0xff]   ;;  %v3081_v35 = vld [vmem:[#allocation2 + $0x300] ss:$16 sps:$4 sm:$0xff]  }
  0x38   :  { %1638 = vmatpush1.bf16.msra.mxu1 %v3056_v18  ;;  %v3082_v36 = vld [vmem:[#allocation2 + $0x124] ss:$16 sps:$4 sm:$0xff]   ;;  %v3086_v38 = vld [vmem:[#allocation2 + $0x120] ss:$16 sps:$4 sm:$0xff]  }
  0x39   :  { %1679 = vmatpush1.bf16.msra.mxu0 %v3057_v19  ;;  %1639 = vmatprep.subr.bf16.mxu1 %v3058_v20  ;;  %v3084_v37 = vld [vmem:[#allocation2 + $0x324] ss:$16 sps:$4 sm:$0xff]   ;;  %v3087_v39 = vld [vmem:[#allocation2 + $0x320] ss:$16 sps:$4 sm:$0xff]   ;;  %v3139_v19 = vld [vmem:[#allocation2 + $0x48] ss:$16 sps:$4 sm:$0xff]  }
  0x3a   :  { %1680 = vmatprep.subr.bf16.mxu0 %v3060_v21  ;;  %v3088_v40 = vld [vmem:[#allocation2 + $0x144] ss:$16 sps:$4 sm:$0xff]   ;;  %v3092_v42 = vld [vmem:[#allocation2 + $0x140] ss:$16 sps:$4 sm:$0xff]   ;;  %v3147_v21 = vld [vmem:[#allocation2 + $0x6c] ss:$16 sps:$4 sm:$0xff]  }
  0x3b   :  { %v3090_v41 = vld [vmem:[#allocation2 + $0x344] ss:$16 sps:$4 sm:$0xff]   ;;  %v3093_v43 = vld [vmem:[#allocation2 + $0x340] ss:$16 sps:$4 sm:$0xff]  }
  0x3c   :  { %1640 = vmatpush1.bf16.msra.mxu1 %v3062_v22  ;;  %v3094_v44 = vld [vmem:[#allocation2 + $0x164] ss:$16 sps:$4 sm:$0xff]   ;;  %v3098_v47 = vld [vmem:[#allocation2 + $0x160] ss:$16 sps:$4 sm:$0xff]  }
  0x3d   :  { %1681 = vmatpush1.bf16.msra.mxu0 %v3063_v23  ;;  %1641 = vmatprep.subr.bf16.mxu1 %v3064_v24  ;;  %v3096_v45 = vld [vmem:[#allocation2 + $0x364] ss:$16 sps:$4 sm:$0xff]   ;;  %v3099_v50 = vld [vmem:[#allocation2 + $0x360] ss:$16 sps:$4 sm:$0xff]   ;;  %v3145_v23 = vld [vmem:[#allocation2 + $0x68] ss:$16 sps:$4 sm:$0xff]  }
  0x3e   :  { %1682 = vmatprep.subr.bf16.mxu0 %v3066_v25  ;;  %v3100_v51 = vld [vmem:[#allocation2 + $0x184] ss:$16 sps:$4 sm:$0xff]   ;;  %v3104_v54 = vld [vmem:[#allocation2 + $0x180] ss:$16 sps:$4 sm:$0xff]   ;;  %v3153_v25 = vld [vmem:[#allocation2 + $0x8c] ss:$16 sps:$4 sm:$0xff]  }
  0x3f   :  { %v3102_v53 = vld [vmem:[#allocation2 + $0x384] ss:$16 sps:$4 sm:$0xff]   ;;  %v3105_v55 = vld [vmem:[#allocation2 + $0x380] ss:$16 sps:$4 sm:$0xff]  }
  0x40   :  { %1642 = vmatpush1.bf16.msra.mxu1 %v3068_v26  ;;  %v3106_v56 = vld [vmem:[#allocation2 + $0x1a4] ss:$16 sps:$4 sm:$0xff]   ;;  %v3110_v58 = vld [vmem:[#allocation2 + $0x1a0] ss:$16 sps:$4 sm:$0xff]  }
  0x41   :  { %1683 = vmatpush1.bf16.msra.mxu0 %v3069_v27  ;;  %1643 = vmatprep.subr.bf16.mxu1 %v3070_v28  ;;  %v3108_v57 = vld [vmem:[#allocation2 + $0x3a4] ss:$16 sps:$4 sm:$0xff]   ;;  %v3111_v59 = vld [vmem:[#allocation2 + $0x3a0] ss:$16 sps:$4 sm:$0xff]   ;;  %v3151_v27 = vld [vmem:[#allocation2 + $0x88] ss:$16 sps:$4 sm:$0xff]  }
  0x42   :  { %1684 = vmatprep.subr.bf16.mxu0 %v3072_v29  ;;  %v3112_v60 = vld [vmem:[#allocation2 + $0x1c4] ss:$16 sps:$4 sm:$0xff]   ;;  %v3116_v62 = vld [vmem:[#allocation2 + $0x1c0] ss:$16 sps:$4 sm:$0xff]   ;;  %v3159_v29 = vld [vmem:[#allocation2 + $0xac] ss:$16 sps:$4 sm:$0xff]  }
  0x43   :  { %v3114_v61 = vld [vmem:[#allocation2 + $0x3c4] ss:$16 sps:$4 sm:$0xff]   ;;  %v3117_v63 = vld [vmem:[#allocation2 + $0x3c0] ss:$16 sps:$4 sm:$0xff]  }
  0x44   :  { %1644 = vmatpush1.bf16.msra.mxu1 %v3074_v30  ;;  %v3118_v0 = vld [vmem:[#allocation2 + $0x1e4] ss:$16 sps:$4 sm:$0xff]   ;;  %v3122_v2 = vld [vmem:[#allocation2 + $0x1e0] ss:$16 sps:$4 sm:$0xff]  }
  0x45   :  { %1685 = vmatpush1.bf16.msra.mxu0 %v3075_v31  ;;  %1645 = vmatprep.subr.bf16.mxu1 %v3076_v32  ;;  %v3120_v1 = vld [vmem:[#allocation2 + $0x3e4] ss:$16 sps:$4 sm:$0xff]   ;;  %v3123_v3 = vld [vmem:[#allocation2 + $0x3e0] ss:$16 sps:$4 sm:$0xff]   ;;  %v3157_v31 = vld [vmem:[#allocation2 + $0xa8] ss:$16 sps:$4 sm:$0xff]  }
  0x46   :  { %1686 = vmatprep.subr.bf16.mxu0 %v3078_v33  ;;  %v55_v4 = vld [vmem:[%s3778_s0] sm:$0xff]  ;;  %v57_v6 = vld [vmem:[%s3778_s0 + $0x10] sm:$0xff]  ;;  %v3165_v33 = vld [vmem:[#allocation2 + $0xcc] ss:$16 sps:$4 sm:$0xff]  }
  0x47   :  { %v3126_v5 = vld [vmem:[#allocation2 + $0x404] ss:$16 sps:$4 sm:$0xff]   ;;  %v3660_v8 = vpack.c.bf16 %v55_v4, %v55_v4  ;;  %v3124_v9 = vld [vmem:[#allocation2 + $0x400] ss:$16 sps:$4 sm:$0xff]   ;;  %v3662_v11 = vpack.c.bf16 %v57_v6, %v57_v6  ;;  %v3213_v4 = vld [vmem:[#allocation2 + $0x1cc] ss:$16 sps:$4 sm:$0xff]  }
  0x48   :  { %1646 = vmatpush1.bf16.msra.mxu1 %v3080_v34  ;;  %v3132_v12 = vld [vmem:[#allocation2 + $0x424] ss:$16 sps:$4 sm:$0xff]   ;;  %v3130_v14 = vld [vmem:[#allocation2 + $0x420] ss:$16 sps:$4 sm:$0xff]   ;;  %v60_v34 = vld [vmem:[%s3778_s0 + $0x28] sm:$0xff] }
  0x49   :  { %1687 = vmatpush1.bf16.msra.mxu0 %v3081_v35  ;;  %1647 = vmatprep.subr.bf16.mxu1 %v3082_v36  ;;  %v3138_v16 = vld [vmem:[#allocation2 + $0x444] ss:$16 sps:$4 sm:$0xff]   ;;  %v3136_v18 = vld [vmem:[#allocation2 + $0x440] ss:$16 sps:$4 sm:$0xff]   ;;  %v3670_v36 = vpack.c.bf16 %v60_v34, %v60_v34  ;;  %v3211_v6 = vld [vmem:[#allocation2 + $0x1c8] ss:$16 sps:$4 sm:$0xff]  }
  0x4a   :  { %1688 = vmatprep.subr.bf16.mxu0 %v3084_v37  ;;  %v3144_v20 = vld [vmem:[#allocation2 + $0x464] ss:$16 sps:$4 sm:$0xff]   ;;  %v3142_v22 = vld [vmem:[#allocation2 + $0x460] ss:$16 sps:$4 sm:$0xff]   ;;  %v3163_v37 = vld [vmem:[#allocation2 + $0xc8] ss:$16 sps:$4 sm:$0xff]  }
  0x4b   :  { %v3150_v24 = vld [vmem:[#allocation2 + $0x484] ss:$16 sps:$4 sm:$0xff]   ;;  %v3148_v26 = vld [vmem:[#allocation2 + $0x480] ss:$16 sps:$4 sm:$0xff]  }
  0x4c   :  { %1648 = vmatpush1.bf16.msra.mxu1 %v3086_v38  ;;  %v3156_v28 = vld [vmem:[#allocation2 + $0x4a4] ss:$16 sps:$4 sm:$0xff]   ;;  %v3154_v30 = vld [vmem:[#allocation2 + $0x4a0] ss:$16 sps:$4 sm:$0xff]  }
  0x4d   :  { %1689 = vmatpush1.bf16.msra.mxu0 %v3087_v39  ;;  %1649 = vmatprep.subr.bf16.mxu1 %v3088_v40  ;;  %v3162_v32 = vld [vmem:[#allocation2 + $0x4c4] ss:$16 sps:$4 sm:$0xff]   ;;  %v3160_v35 = vld [vmem:[#allocation2 + $0x4c0] ss:$16 sps:$4 sm:$0xff]   ;;  %v3171_v39 = vld [vmem:[#allocation2 + $0xec] ss:$16 sps:$4 sm:$0xff]  }
  0x4e   :  { %1690 = vmatprep.subr.bf16.mxu0 %v3090_v41  ;;  %v3168_v38 = vld [vmem:[#allocation2 + $0x4e4] ss:$16 sps:$4 sm:$0xff]   ;;  %v3166_v40 = vld [vmem:[#allocation2 + $0x4e0] ss:$16 sps:$4 sm:$0xff]   ;;  %v3169_v41 = vld [vmem:[#allocation2 + $0xe8] ss:$16 sps:$4 sm:$0xff]  }
  0x4f   :  { %v3180_v46 = vld [vmem:[#allocation2 + $0x524] ss:$16 sps:$4 sm:$0xff]   ;;  %v3244_v34 = vld [vmem:[#allocation2 + $0x680] ss:$16 sps:$4 sm:$0xff]  }
  0x50   :  { %1650 = vmatpush1.bf16.msra.mxu1 %v3092_v42  ;;  %v3174_v42 = vld [vmem:[#allocation2 + $0x504] ss:$16 sps:$4 sm:$0xff]  }
  0x51   :  { %1691 = vmatpush1.bf16.msra.mxu0 %v3093_v43  ;;  %1651 = vmatprep.subr.bf16.mxu1 %v3094_v44  ;;  %v3177_v43 = vld [vmem:[#allocation2 + $0x10c] ss:$16 sps:$4 sm:$0xff]   ;;  %v3172_v44 = vld [vmem:[#allocation2 + $0x500] ss:$16 sps:$4 sm:$0xff]  }
  0x52   :  { %1692 = vmatprep.subr.bf16.mxu0 %v3096_v45  ;;  %v3175_v45 = vld [vmem:[#allocation2 + $0x108] ss:$16 sps:$4 sm:$0xff]  }
  0x54   :  { %1652 = vmatpush1.bf16.msra.mxu1 %v3098_v47  ;;  %v3183_v47 = vld [vmem:[#allocation2 + $0x12c] ss:$16 sps:$4 sm:$0xff]  }
  0x55   :  { %1693 = vmatpush1.bf16.msra.mxu0 %v3099_v50  ;;  %1653 = vmatprep.subr.bf16.mxu1 %v3100_v51  ;;  %v3186_v50 = vld [vmem:[#allocation2 + $0x544] ss:$16 sps:$4 sm:$0xff]   ;;  %v3189_v51 = vld [vmem:[#allocation2 + $0x14c] ss:$16 sps:$4 sm:$0xff]  }
  0x56   :  { %1694 = vmatprep.subr.bf16.mxu0 %v3102_v53  ;;  %v3184_v53 = vld [vmem:[#allocation2 + $0x540] ss:$16 sps:$4 sm:$0xff]  }
  0x58   :  { %1654 = vmatpush1.bf16.msra.mxu1 %v3104_v54  ;;  %v3187_v54 = vld [vmem:[#allocation2 + $0x148] ss:$16 sps:$4 sm:$0xff]  }
  0x59   :  { %1695 = vmatpush1.bf16.msra.mxu0 %v3105_v55  ;;  %1655 = vmatprep.subr.bf16.mxu1 %v3106_v56  ;;  %v3192_v55 = vld [vmem:[#allocation2 + $0x564] ss:$16 sps:$4 sm:$0xff]   ;;  %v3195_v56 = vld [vmem:[#allocation2 + $0x16c] ss:$16 sps:$4 sm:$0xff]  }
  0x5a   :  { %1696 = vmatprep.subr.bf16.mxu0 %v3108_v57  ;;  %v3190_v57 = vld [vmem:[#allocation2 + $0x560] ss:$16 sps:$4 sm:$0xff]  }
  0x5c   :  { %1656 = vmatpush1.bf16.msra.mxu1 %v3110_v58  ;;  %v3193_v58 = vld [vmem:[#allocation2 + $0x168] ss:$16 sps:$4 sm:$0xff]  }
  0x5d   :  { %1697 = vmatpush1.bf16.msra.mxu0 %v3111_v59  ;;  %1657 = vmatprep.subr.bf16.mxu1 %v3112_v60  ;;  %v3198_v59 = vld [vmem:[#allocation2 + $0x584] ss:$16 sps:$4 sm:$0xff]   ;;  %v3201_v60 = vld [vmem:[#allocation2 + $0x18c] ss:$16 sps:$4 sm:$0xff]  }
  0x5e   :  { %1698 = vmatprep.subr.bf16.mxu0 %v3114_v61  ;;  %v3196_v61 = vld [vmem:[#allocation2 + $0x580] ss:$16 sps:$4 sm:$0xff]  }
  0x60   :  { %1658 = vmatpush1.bf16.msra.mxu1 %v3116_v62  ;;  %v3199_v62 = vld [vmem:[#allocation2 + $0x188] ss:$16 sps:$4 sm:$0xff]  }
  0x61   :  { %1699 = vmatpush1.bf16.msra.mxu0 %v3117_v63  ;;  %1659 = vmatprep.subr.bf16.mxu1 %v3118_v0  ;;  %v3204_v63 = vld [vmem:[#allocation2 + $0x5a4] ss:$16 sps:$4 sm:$0xff]   ;;  %v3207_v0 = vld [vmem:[#allocation2 + $0x1ac] ss:$16 sps:$4 sm:$0xff]  }
  0x62   :  { %1700 = vmatprep.subr.bf16.mxu0 %v3120_v1  ;;  %v3202_v1 = vld [vmem:[#allocation2 + $0x5a0] ss:$16 sps:$4 sm:$0xff]  }
  0x64   :  { %1660 = vmatpush1.bf16.msra.mxu1 %v3122_v2  ;;  %v3205_v2 = vld [vmem:[#allocation2 + $0x1a8] ss:$16 sps:$4 sm:$0xff]  }
  0x65   :  { %1701 = vmatpush1.bf16.msra.mxu0 %v3123_v3  ;;  %1793 = vmatprep.subr.bf16.mxu1 %v3129_v7  ;;  %v3210_v3 = vld [vmem:[#allocation2 + $0x5c4] ss:$16 sps:$4 sm:$0xff]  }
  0x66   :  { %1711 = vmatprep.subr.bf16.mxu0 %v3126_v5  ;;  %v3208_v5 = vld [vmem:[#allocation2 + $0x5c0] ss:$16 sps:$4 sm:$0xff]   ;;  %v3216_v7 = vld [vmem:[#allocation2 + $0x5e4] ss:$16 sps:$4 sm:$0xff]  }
  0x67   :  { %1662 = vmatmul.mubr.bf16.vlgmr.msra.gmra.mrb[0].mxu1 %v3660_v8 }
  0x68   :  { %1703 = vmatmul.mubr.bf16.vlgmr.msra.gmra.mrb[0].mxu0 %v3662_v11  ;;  %1794 = vmatpush1.bf16.msra.mxu1 %v3127_v10  ;;  %v3214_v10 = vld [vmem:[#allocation2 + $0x5e0] ss:$16 sps:$4 sm:$0xff]  }
  0x69   :  { %1712 = vmatpush1.bf16.msra.mxu0 %v3124_v9  ;;  %1795 = vmatprep.subr.bf16.mxu1 %v3135_v13  ;;  %v3219_v9 = vld [vmem:[#allocation2 + $0x1ec] ss:$16 sps:$4 sm:$0xff]   ;;  %v59_v13 = vld [vmem:[%s3778_s0 + $0x20] sm:$0xff] }
  0x6a   :  { %1713 = vmatprep.subr.bf16.mxu0 %v3132_v12  ;;  %1825 = vmatprep.mubr.bf16.mxu1 %v3645_v48  ;;  %v3178_v48 = vld [vmem:[#allocation2 + $0x520] ss:$16 sps:$4 sm:$0xff]   ;;  %v3217_v12 = vld [vmem:[#allocation2 + $0x1e8] ss:$16 sps:$4 sm:$0xff]  }
  0x6b   :  { %1743 = vmatprep.mubr.bf16.mxu0 %v3670_v36 }
  0x6c   :  { %1796 = vmatpush1.bf16.msra.mxu1 %v3133_v15  ;;  %v3225_v15 = vld [vmem:[#allocation2 + $0x20c] ss:$16 sps:$4 sm:$0xff]  }
  0x6d   :  { %1714 = vmatpush1.bf16.msra.mxu0 %v3130_v14  ;;  %1797 = vmatprep.subr.bf16.mxu1 %v3141_v17  ;;  %v3222_v14 = vld [vmem:[#allocation2 + $0x604] ss:$16 sps:$4 sm:$0xff]   ;;  %v3220_v17 = vld [vmem:[#allocation2 + $0x600] ss:$16 sps:$4 sm:$0xff]  }
  0x6e   :  { %1715 = vmatprep.subr.bf16.mxu0 %v3138_v16  ;;  %v3676_v16 = vpack.c.bf16 %v59_v13, %v59_v13  ;;  %v3304_v13 = vld [vmem:[#allocation2 + $0x7c0] ss:$16 sps:$4 sm:$0xff]  }
  0x70   :  { %1798 = vmatpush1.bf16.msra.mxu1 %v3139_v19  ;;  %v3228_v19 = vld [vmem:[#allocation2 + $0x624] ss:$16 sps:$4 sm:$0xff]  }
  0x71   :  { %1716 = vmatpush1.bf16.msra.mxu0 %v3136_v18  ;;  %1799 = vmatprep.subr.bf16.mxu1 %v3147_v21  ;;  %v3223_v18 = vld [vmem:[#allocation2 + $0x208] ss:$16 sps:$4 sm:$0xff]  }
  0x72   :  { %1717 = vmatprep.subr.bf16.mxu0 %v3144_v20  ;;  %v3231_v20 = vld [vmem:[#allocation2 + $0x22c] ss:$16 sps:$4 sm:$0xff]  }
  0x73   :  { %v62_v21 = vld [vmem:[%s3778_s0 + $0x38] sm:$0xff] }
  0x74   :  { %1800 = vmatpush1.bf16.msra.mxu1 %v3145_v23  ;;  %v3229_v23 = vld [vmem:[#allocation2 + $0x228] ss:$16 sps:$4 sm:$0xff]  }
  0x75   :  { %1718 = vmatpush1.bf16.msra.mxu0 %v3142_v22  ;;  %1801 = vmatprep.subr.bf16.mxu1 %v3153_v25  ;;  %v3226_v22 = vld [vmem:[#allocation2 + $0x620] ss:$16 sps:$4 sm:$0xff]   ;;  %v3234_v25 = vld [vmem:[#allocation2 + $0x644] ss:$16 sps:$4 sm:$0xff]  }
  0x76   :  { %1719 = vmatprep.subr.bf16.mxu0 %v3150_v24  ;;  %v3683_v24 = vpack.c.bf16 %v62_v21, %v62_v21  ;;  %v3318_v21 = vld [vmem:[#allocation2 + $0x40c] ss:$16 sps:$4 sm:$0xff]  }
  0x78   :  { %1802 = vmatpush1.bf16.msra.mxu1 %v3151_v27  ;;  %v3232_v27 = vld [vmem:[#allocation2 + $0x640] ss:$16 sps:$4 sm:$0xff]  }
  0x79   :  { %1720 = vmatpush1.bf16.msra.mxu0 %v3148_v26  ;;  %1803 = vmatprep.subr.bf16.mxu1 %v3159_v29  ;;  %v3237_v26 = vld [vmem:[#allocation2 + $0x24c] ss:$16 sps:$4 sm:$0xff]   ;;  %v3240_v29 = vld [vmem:[#allocation2 + $0x664] ss:$16 sps:$4 sm:$0xff]  }
  0x7a   :  { %1721 = vmatprep.subr.bf16.mxu0 %v3156_v28  ;;  %v3235_v28 = vld [vmem:[#allocation2 + $0x248] ss:$16 sps:$4 sm:$0xff]  }
  0x7c   :  { %1804 = vmatpush1.bf16.msra.mxu1 %v3157_v31  ;;  %v3241_v31 = vld [vmem:[#allocation2 + $0x268] ss:$16 sps:$4 sm:$0xff]  }
  0x7d   :  { %1722 = vmatpush1.bf16.msra.mxu0 %v3154_v30  ;;  %1805 = vmatprep.subr.bf16.mxu1 %v3165_v33  ;;  %v3238_v30 = vld [vmem:[#allocation2 + $0x660] ss:$16 sps:$4 sm:$0xff]   ;;  %v3249_v33 = vld [vmem:[#allocation2 + $0x28c] ss:$16 sps:$4 sm:$0xff]  }
  0x7e   :  { %1723 = vmatprep.subr.bf16.mxu0 %v3162_v32  ;;  %v3246_v32 = vld [vmem:[#allocation2 + $0x684] ss:$16 sps:$4 sm:$0xff]  }
  0x80   :  { %1806 = vmatpush1.bf16.msra.mxu1 %v3163_v37  ;;  %v3255_v37 = vld [vmem:[#allocation2 + $0x2ac] ss:$16 sps:$4 sm:$0xff]  }
  0x81   :  { %1724 = vmatpush1.bf16.msra.mxu0 %v3160_v35  ;;  %1807 = vmatprep.subr.bf16.mxu1 %v3171_v39  ;;  %v3247_v35 = vld [vmem:[#allocation2 + $0x288] ss:$16 sps:$4 sm:$0xff]  }
  0x82   :  { %1725 = vmatprep.subr.bf16.mxu0 %v3168_v38  ;;  %v3250_v38 = vld [vmem:[#allocation2 + $0x6a0] ss:$16 sps:$4 sm:$0xff]   ;;  %v3253_v39 = vld [vmem:[#allocation2 + $0x2a8] ss:$16 sps:$4 sm:$0xff]  }
  0x84   :  { %1808 = vmatpush1.bf16.msra.mxu1 %v3169_v41  ;;  %v3261_v41 = vld [vmem:[#allocation2 + $0x2cc] ss:$16 sps:$4 sm:$0xff]  }
  0x85   :  { %1726 = vmatpush1.bf16.msra.mxu0 %v3166_v40  ;;  %1809 = vmatprep.subr.bf16.mxu1 %v3177_v43  ;;  %v3258_v40 = vld [vmem:[#allocation2 + $0x6c4] ss:$16 sps:$4 sm:$0xff]   ;;  %v3259_v43 = vld [vmem:[#allocation2 + $0x2c8] ss:$16 sps:$4 sm:$0xff]  }
  0x86   :  { %1727 = vmatprep.subr.bf16.mxu0 %v3174_v42  ;;  %v3256_v42 = vld [vmem:[#allocation2 + $0x6c0] ss:$16 sps:$4 sm:$0xff]  }
  0x88   :  { %1810 = vmatpush1.bf16.msra.mxu1 %v3175_v45  ;;  %v3267_v45 = vld [vmem:[#allocation2 + $0x2ec] ss:$16 sps:$4 sm:$0xff]  }
  0x89   :  { %1728 = vmatpush1.bf16.msra.mxu0 %v3172_v44  ;;  %1811 = vmatprep.subr.bf16.mxu1 %v3183_v47  ;;  %v3264_v44 = vld [vmem:[#allocation2 + $0x6e4] ss:$16 sps:$4 sm:$0xff]   ;;  %v3265_v47 = vld [vmem:[#allocation2 + $0x2e8] ss:$16 sps:$4 sm:$0xff]  }
  0x8a   :  { %1729 = vmatprep.subr.bf16.mxu0 %v3180_v46  ;;  %v3262_v46 = vld [vmem:[#allocation2 + $0x6e0] ss:$16 sps:$4 sm:$0xff]  }
  0x8c   :  { %1812 = vmatpush1.bf16.msra.mxu1 %v3181_v49  ;;  %v3273_v49 = vld [vmem:[#allocation2 + $0x30c] ss:$16 sps:$4 sm:$0xff]  }
  0x8d   :  { %1730 = vmatpush1.bf16.msra.mxu0 %v3178_v48  ;;  %1813 = vmatprep.subr.bf16.mxu1 %v3189_v51  ;;  %v3270_v48 = vld [vmem:[#allocation2 + $0x704] ss:$16 sps:$4 sm:$0xff]   ;;  %v3271_v51 = vld [vmem:[#allocation2 + $0x308] ss:$16 sps:$4 sm:$0xff]  }
  0x8e   :  { %1731 = vmatprep.subr.bf16.mxu0 %v3186_v50  ;;  %v3268_v50 = vld [vmem:[#allocation2 + $0x700] ss:$16 sps:$4 sm:$0xff]  }
  0x90   :  { %1814 = vmatpush1.bf16.msra.mxu1 %v3187_v54  ;;  %v3279_v54 = vld [vmem:[#allocation2 + $0x32c] ss:$16 sps:$4 sm:$0xff]  }
  0x91   :  { %1732 = vmatpush1.bf16.msra.mxu0 %v3184_v53  ;;  %1815 = vmatprep.subr.bf16.mxu1 %v3195_v56  ;;  %v3276_v53 = vld [vmem:[#allocation2 + $0x724] ss:$16 sps:$4 sm:$0xff]   ;;  %v3277_v56 = vld [vmem:[#allocation2 + $0x328] ss:$16 sps:$4 sm:$0xff]  }
  0x92   :  { %1733 = vmatprep.subr.bf16.mxu0 %v3192_v55  ;;  %v3274_v55 = vld [vmem:[#allocation2 + $0x720] ss:$16 sps:$4 sm:$0xff]  }
  0x94   :  { %1816 = vmatpush1.bf16.msra.mxu1 %v3193_v58  ;;  %v3285_v58 = vld [vmem:[#allocation2 + $0x34c] ss:$16 sps:$4 sm:$0xff]  }
  0x95   :  { %1734 = vmatpush1.bf16.msra.mxu0 %v3190_v57  ;;  %1817 = vmatprep.subr.bf16.mxu1 %v3201_v60  ;;  %v3282_v57 = vld [vmem:[#allocation2 + $0x744] ss:$16 sps:$4 sm:$0xff]   ;;  %v3283_v60 = vld [vmem:[#allocation2 + $0x348] ss:$16 sps:$4 sm:$0xff]  }
  0x96   :  { %1735 = vmatprep.subr.bf16.mxu0 %v3198_v59  ;;  %v3280_v59 = vld [vmem:[#allocation2 + $0x740] ss:$16 sps:$4 sm:$0xff]  }
  0x98   :  { %1818 = vmatpush1.bf16.msra.mxu1 %v3199_v62  ;;  %v3291_v62 = vld [vmem:[#allocation2 + $0x36c] ss:$16 sps:$4 sm:$0xff]  }
  0x99   :  { %1736 = vmatpush1.bf16.msra.mxu0 %v3196_v61  ;;  %1819 = vmatprep.subr.bf16.mxu1 %v3207_v0  ;;  %v3288_v61 = vld [vmem:[#allocation2 + $0x764] ss:$16 sps:$4 sm:$0xff]   ;;  %v3289_v0 = vld [vmem:[#allocation2 + $0x368] ss:$16 sps:$4 sm:$0xff]  }
  0x9a   :  { %1737 = vmatprep.subr.bf16.mxu0 %v3204_v63  ;;  %v3286_v63 = vld [vmem:[#allocation2 + $0x760] ss:$16 sps:$4 sm:$0xff]  }
  0x9c   :  { %1820 = vmatpush1.bf16.msra.mxu1 %v3205_v2  ;;  %v3297_v2 = vld [vmem:[#allocation2 + $0x38c] ss:$16 sps:$4 sm:$0xff]  }
  0x9d   :  { %1738 = vmatpush1.bf16.msra.mxu0 %v3202_v1  ;;  %1821 = vmatprep.subr.bf16.mxu1 %v3213_v4  ;;  %v3294_v1 = vld [vmem:[#allocation2 + $0x784] ss:$16 sps:$4 sm:$0xff]   ;;  %v3295_v4 = vld [vmem:[#allocation2 + $0x388] ss:$16 sps:$4 sm:$0xff]  }
  0x9e   :  { %1739 = vmatprep.subr.bf16.mxu0 %v3210_v3  ;;  %v3292_v3 = vld [vmem:[#allocation2 + $0x780] ss:$16 sps:$4 sm:$0xff]  }
  0xa0   :  { %1822 = vmatpush1.bf16.msra.mxu1 %v3211_v6  ;;  %v3303_v6 = vld [vmem:[#allocation2 + $0x3ac] ss:$16 sps:$4 sm:$0xff]  }
  0xa1   :  { %1740 = vmatpush1.bf16.msra.mxu0 %v3208_v5  ;;  %1823 = vmatprep.subr.bf16.mxu1 %v3219_v9  ;;  %v3300_v5 = vld [vmem:[#allocation2 + $0x7a4] ss:$16 sps:$4 sm:$0xff]   ;;  %v3301_v9 = vld [vmem:[#allocation2 + $0x3a8] ss:$16 sps:$4 sm:$0xff]  }
  0xa2   :  { %1741 = vmatprep.subr.bf16.mxu0 %v3216_v7  ;;  %v3298_v7 = vld [vmem:[#allocation2 + $0x7a0] ss:$16 sps:$4 sm:$0xff]  }
  0xa4   :  { %1824 = vmatpush1.bf16.msra.mxu1 %v3217_v12  ;;  %v3309_v12 = vld [vmem:[#allocation2 + $0x3cc] ss:$16 sps:$4 sm:$0xff]  }
  0xa5   :  { %1742 = vmatpush1.bf16.msra.mxu0 %v3214_v10  ;;  %1834 = vmatprep.subr.bf16.mxu1 %v3225_v15  ;;  %v3306_v10 = vld [vmem:[#allocation2 + $0x7c4] ss:$16 sps:$4 sm:$0xff]  }
  0xa6   :  { %1752 = vmatprep.subr.bf16.mxu0 %v3222_v14  ;;  %v3307_v14 = vld [vmem:[#allocation2 + $0x3c8] ss:$16 sps:$4 sm:$0xff]   ;;  %v3312_v15 = vld [vmem:[#allocation2 + $0x7e4] ss:$16 sps:$4 sm:$0xff]  }
  0xa7   :  { %1826 = vmatmul.mubr.bf16.vlgmr.msra.gmra.mrb[4].mxu1 %v3660_v8  ;;  %v3243_v8 = vld [vmem:[#allocation2 + $0x26c] ss:$16 sps:$4 sm:$0xff]  }
  0xa8   :  { %1744 = vmatmul.mubr.bf16.vlgmr.msra.gmra.mrb[0].mxu0 %v3676_v16  ;;  %1835 = vmatpush1.bf16.msra.mxu1 %v3223_v18  ;;  %v3310_v18 = vld [vmem:[#allocation2 + $0x7e0] ss:$16 sps:$4 sm:$0xff]  }
  0xa9   :  { %1753 = vmatpush1.bf16.msra.mxu0 %v3220_v17  ;;  %1836 = vmatprep.subr.bf16.mxu1 %v3231_v20  ;;  %v3315_v17 = vld [vmem:[#allocation2 + $0x3ec] ss:$16 sps:$4 sm:$0xff]   ;;  %v61_v20 = vld [vmem:[%s3778_s0 + $0x30] sm:$0xff] }
  0xaa   :  { %1754 = vmatprep.subr.bf16.mxu0 %v3228_v19  ;;  %1784 = vmatprep.mubr.bf16.mxu0 %v3683_v24  ;;  %v3313_v19 = vld [vmem:[#allocation2 + $0x3e8] ss:$16 sps:$4 sm:$0xff]  }
  0xab   :  { %1866 = vmatprep.mubr.bf16.mxu1 %v3650_v52  ;;  %v3252_v52 = vld [vmem:[#allocation2 + $0x6a4] ss:$16 sps:$4 sm:$0xff]  }
  0xac   :  { %1837 = vmatpush1.bf16.msra.mxu1 %v3229_v23  ;;  %v3690_v23 = vpack.c.bf16 %v61_v20, %v61_v20  ;;  %v3366_v20 = vld [vmem:[#allocation2 + $0x60c] ss:$16 sps:$4 sm:$0xff]  }
  0xad   :  { %1755 = vmatpush1.bf16.msra.mxu0 %v3226_v22  ;;  %1838 = vmatprep.subr.bf16.mxu1 %v3237_v26  ;;  %v3316_v22 = vld [vmem:[#allocation2 + $0x408] ss:$16 sps:$4 sm:$0xff]  }
  0xae   :  { %1756 = vmatprep.subr.bf16.mxu0 %v3234_v25  ;;  %v3321_v25 = vld [vmem:[#allocation2 + $0x42c] ss:$16 sps:$4 sm:$0xff]   ;;  %v3412_v26 = vld [vmem:[#allocation4] ss:$8 sps:$4 sm:$0xff]  }
  0xb0   :  { %1839 = vmatpush1.bf16.msra.mxu1 %v3235_v28  ;;  %v3319_v28 = vld [vmem:[#allocation2 + $0x428] ss:$16 sps:$4 sm:$0xff]  }
  0xb1   :  { %1757 = vmatpush1.bf16.msra.mxu0 %v3232_v27  ;;  %1840 = vmatprep.subr.bf16.mxu1 %v3243_v8  ;;  %v3414_v27 = vld [vmem:[#allocation4 + $0x4] ss:$8 sps:$4 sm:$0xff]  }
  0xb2   :  { %1758 = vmatprep.subr.bf16.mxu0 %v3240_v29  ;;  %v3417_v29 = vld [vmem:[#allocation4 + $0x14] ss:$8 sps:$4 sm:$0xff]  }
  0xb3   :  { %v3324_v8 = vld [vmem:[#allocation2 + $0x44c] ss:$16 sps:$4 sm:$0xff]  }
  0xb4   :  { %1841 = vmatpush1.bf16.msra.mxu1 %v3241_v31  ;;  %v3420_v31 = vld [vmem:[#allocation4 + $0x24] ss:$8 sps:$4 sm:$0xff]  }
  0xb5   :  { %1759 = vmatpush1.bf16.msra.mxu0 %v3238_v30  ;;  %1842 = vmatprep.subr.bf16.mxu1 %v3249_v33  ;;  %v3415_v30 = vld [vmem:[#allocation4 + $0x10] ss:$8 sps:$4 sm:$0xff]   ;;  %v3327_v33 = vld [vmem:[#allocation2 + $0x46c] ss:$16 sps:$4 sm:$0xff]  }
  0xb6   :  { %1760 = vmatprep.subr.bf16.mxu0 %v3246_v32  ;;  %v3322_v32 = vld [vmem:[#allocation2 + $0x448] ss:$16 sps:$4 sm:$0xff]  }
  0xb8   :  { %1843 = vmatpush1.bf16.msra.mxu1 %v3247_v35  ;;  %v3330_v35 = vld [vmem:[#allocation2 + $0x48c] ss:$16 sps:$4 sm:$0xff]  }
  0xb9   :  { %1761 = vmatpush1.bf16.msra.mxu0 %v3244_v34  ;;  %1844 = vmatprep.subr.bf16.mxu1 %v3255_v37  ;;  %v3325_v34 = vld [vmem:[#allocation2 + $0x468] ss:$16 sps:$4 sm:$0xff]   ;;  %v3426_v37 = vld [vmem:[#allocation4 + $0x44] ss:$8 sps:$4 sm:$0xff]  }
  0xba   :  { %1762 = vmatprep.subr.bf16.mxu0 %v3252_v52  ;;  %v3423_v52 = vld [vmem:[#allocation4 + $0x34] ss:$8 sps:$4 sm:$0xff]  }
  0xbc   :  { %1845 = vmatpush1.bf16.msra.mxu1 %v3253_v39  ;;  %v3333_v39 = vld [vmem:[#allocation2 + $0x4ac] ss:$16 sps:$4 sm:$0xff]  }
  0xbd   :  { %1763 = vmatpush1.bf16.msra.mxu0 %v3250_v38  ;;  %1846 = vmatprep.subr.bf16.mxu1 %v3261_v41  ;;  %v3328_v38 = vld [vmem:[#allocation2 + $0x488] ss:$16 sps:$4 sm:$0xff]   ;;  %v3429_v41 = vld [vmem:[#allocation4 + $0x54] ss:$8 sps:$4 sm:$0xff]  }
  0xbe   :  { %1764 = vmatprep.subr.bf16.mxu0 %v3258_v40  ;;  %v3424_v40 = vld [vmem:[#allocation4 + $0x40] ss:$8 sps:$4 sm:$0xff]  }
  0xc0   :  { %1847 = vmatpush1.bf16.msra.mxu1 %v3259_v43  ;;  %v3336_v43 = vld [vmem:[#allocation2 + $0x4cc] ss:$16 sps:$4 sm:$0xff]  }
  0xc1   :  { %1765 = vmatpush1.bf16.msra.mxu0 %v3256_v42  ;;  %1848 = vmatprep.subr.bf16.mxu1 %v3267_v45  ;;  %v3331_v42 = vld [vmem:[#allocation2 + $0x4a8] ss:$16 sps:$4 sm:$0xff]   ;;  %v3432_v45 = vld [vmem:[#allocation4 + $0x64] ss:$8 sps:$4 sm:$0xff]  }
  0xc2   :  { %1766 = vmatprep.subr.bf16.mxu0 %v3264_v44  ;;  %v3427_v44 = vld [vmem:[#allocation4 + $0x50] ss:$8 sps:$4 sm:$0xff]  }
  0xc4   :  { %1849 = vmatpush1.bf16.msra.mxu1 %v3265_v47  ;;  %v3339_v47 = vld [vmem:[#allocation2 + $0x4ec] ss:$16 sps:$4 sm:$0xff]  }
  0xc5   :  { %1767 = vmatpush1.bf16.msra.mxu0 %v3262_v46  ;;  %1850 = vmatprep.subr.bf16.mxu1 %v3273_v49  ;;  %v3334_v46 = vld [vmem:[#allocation2 + $0x4c8] ss:$16 sps:$4 sm:$0xff]   ;;  %v3435_v49 = vld [vmem:[#allocation4 + $0x74] ss:$8 sps:$4 sm:$0xff]  }
  0xc6   :  { %1768 = vmatprep.subr.bf16.mxu0 %v3270_v48  ;;  %v3430_v48 = vld [vmem:[#allocation4 + $0x60] ss:$8 sps:$4 sm:$0xff]  }
  0xc8   :  { %1851 = vmatpush1.bf16.msra.mxu1 %v3271_v51  ;;  %v3342_v51 = vld [vmem:[#allocation2 + $0x50c] ss:$16 sps:$4 sm:$0xff]  }
  0xc9   :  { %1769 = vmatpush1.bf16.msra.mxu0 %v3268_v50  ;;  %1852 = vmatprep.subr.bf16.mxu1 %v3279_v54  ;;  %v3337_v50 = vld [vmem:[#allocation2 + $0x4e8] ss:$16 sps:$4 sm:$0xff]   ;;  %v3438_v54 = vld [vmem:[#allocation4 + $0x84] ss:$8 sps:$4 sm:$0xff]  }
  0xca   :  { %1770 = vmatprep.subr.bf16.mxu0 %v3276_v53  ;;  %v3433_v53 = vld [vmem:[#allocation4 + $0x70] ss:$8 sps:$4 sm:$0xff]  }
  0xcc   :  { %1853 = vmatpush1.bf16.msra.mxu1 %v3277_v56  ;;  %v3345_v56 = vld [vmem:[#allocation2 + $0x52c] ss:$16 sps:$4 sm:$0xff]  }
  0xcd   :  { %1771 = vmatpush1.bf16.msra.mxu0 %v3274_v55  ;;  %1854 = vmatprep.subr.bf16.mxu1 %v3285_v58  ;;  %v3340_v55 = vld [vmem:[#allocation2 + $0x508] ss:$16 sps:$4 sm:$0xff]   ;;  %v3441_v58 = vld [vmem:[#allocation4 + $0x94] ss:$8 sps:$4 sm:$0xff]  }
  0xce   :  { %1772 = vmatprep.subr.bf16.mxu0 %v3282_v57  ;;  %v3436_v57 = vld [vmem:[#allocation4 + $0x80] ss:$8 sps:$4 sm:$0xff]  }
  0xd0   :  { %1855 = vmatpush1.bf16.msra.mxu1 %v3283_v60  ;;  %v3348_v60 = vld [vmem:[#allocation2 + $0x54c] ss:$16 sps:$4 sm:$0xff]  }
  0xd1   :  { %1773 = vmatpush1.bf16.msra.mxu0 %v3280_v59  ;;  %1856 = vmatprep.subr.bf16.mxu1 %v3291_v62  ;;  %v3343_v59 = vld [vmem:[#allocation2 + $0x528] ss:$16 sps:$4 sm:$0xff]   ;;  %v3444_v62 = vld [vmem:[#allocation4 + $0xa4] ss:$8 sps:$4 sm:$0xff]  }
  0xd2   :  { %1774 = vmatprep.subr.bf16.mxu0 %v3288_v61  ;;  %v3439_v61 = vld [vmem:[#allocation4 + $0x90] ss:$8 sps:$4 sm:$0xff]  }
  0xd4   :  { %1857 = vmatpush1.bf16.msra.mxu1 %v3289_v0  ;;  %v3351_v0 = vld [vmem:[#allocation2 + $0x56c] ss:$16 sps:$4 sm:$0xff]  }
  0xd5   :  { %1775 = vmatpush1.bf16.msra.mxu0 %v3286_v63  ;;  %1858 = vmatprep.subr.bf16.mxu1 %v3297_v2  ;;  %v3346_v63 = vld [vmem:[#allocation2 + $0x548] ss:$16 sps:$4 sm:$0xff]   ;;  %v3447_v2 = vld [vmem:[#allocation4 + $0xb4] ss:$8 sps:$4 sm:$0xff]  }
  0xd6   :  { %1776 = vmatprep.subr.bf16.mxu0 %v3294_v1  ;;  %v3442_v1 = vld [vmem:[#allocation4 + $0xa0] ss:$8 sps:$4 sm:$0xff]  }
  0xd8   :  { %1859 = vmatpush1.bf16.msra.mxu1 %v3295_v4  ;;  %v3354_v4 = vld [vmem:[#allocation2 + $0x58c] ss:$16 sps:$4 sm:$0xff]  }
  0xd9   :  { %1777 = vmatpush1.bf16.msra.mxu0 %v3292_v3  ;;  %1860 = vmatprep.subr.bf16.mxu1 %v3303_v6  ;;  %v3349_v3 = vld [vmem:[#allocation2 + $0x568] ss:$16 sps:$4 sm:$0xff]   ;;  %v3450_v6 = vld [vmem:[#allocation4 + $0xc4] ss:$8 sps:$4 sm:$0xff]  }
  0xda   :  { %1778 = vmatprep.subr.bf16.mxu0 %v3300_v5  ;;  %v3445_v5 = vld [vmem:[#allocation4 + $0xb0] ss:$8 sps:$4 sm:$0xff]  }
  0xdc   :  { %1861 = vmatpush1.bf16.msra.mxu1 %v3301_v9  ;;  %v3357_v9 = vld [vmem:[#allocation2 + $0x5ac] ss:$16 sps:$4 sm:$0xff]  }
  0xdd   :  { %1779 = vmatpush1.bf16.msra.mxu0 %v3298_v7  ;;  %1862 = vmatprep.subr.bf16.mxu1 %v3309_v12  ;;  %v3352_v7 = vld [vmem:[#allocation2 + $0x588] ss:$16 sps:$4 sm:$0xff]   ;;  %v3453_v12 = vld [vmem:[#allocation4 + $0xd4] ss:$8 sps:$4 sm:$0xff]  }
  0xde   :  { %1780 = vmatprep.subr.bf16.mxu0 %v3306_v10  ;;  %v3448_v10 = vld [vmem:[#allocation4 + $0xc0] ss:$8 sps:$4 sm:$0xff]  }
  0xe0   :  { %1863 = vmatpush1.bf16.msra.mxu1 %v3307_v14  ;;  %v3360_v14 = vld [vmem:[#allocation2 + $0x5cc] ss:$16 sps:$4 sm:$0xff]  }
  0xe1   :  { %1781 = vmatpush1.bf16.msra.mxu0 %v3304_v13  ;;  %1864 = vmatprep.subr.bf16.mxu1 %v3315_v17  ;;  %v3355_v13 = vld [vmem:[#allocation2 + $0x5a8] ss:$16 sps:$4 sm:$0xff]  }
  0xe2   :  { %1782 = vmatprep.subr.bf16.mxu0 %v3312_v15  ;;  %v3451_v15 = vld [vmem:[#allocation4 + $0xd0] ss:$8 sps:$4 sm:$0xff]  }
  0xe3   :  { %v3358_v17 = vld [vmem:[#allocation2 + $0x5c8] ss:$16 sps:$4 sm:$0xff]  }
  0xe4   :  { %1865 = vmatpush1.bf16.msra.mxu1 %v3313_v19  ;;  %v3361_v19 = vld [vmem:[#allocation2 + $0x5e8] ss:$16 sps:$4 sm:$0xff]  }
  0xe5   :  { %1783 = vmatpush1.bf16.msra.mxu0 %v3310_v18  ;;  %1875 = vmatprep.subr.bf16.mxu1 %v3318_v21  ;;  %v3363_v18 = vld [vmem:[#allocation2 + $0x5ec] ss:$16 sps:$4 sm:$0xff]   ;;  %v3364_v21 = vld [vmem:[#allocation2 + $0x608] ss:$16 sps:$4 sm:$0xff]  }
  0xe6   :  { %2361 = vmatprep.subr.bf16.mxu0 %v3414_v27  ;;  %v3370_v27 = vld [vmem:[#allocation2 + $0x648] ss:$16 sps:$4 sm:$0xff]  }
  0xe7   :  { %1867 = vmatmul.mubr.bf16.vlgmr.msra.gmra.mrb[4].mxu1 %v3662_v11  ;;  %v3418_v11 = vld [vmem:[#allocation4 + $0x20] ss:$8 sps:$4 sm:$0xff]  }
  0xe8   :  { %1785 = vmatmul.mubr.bf16.vlgmr.msra.gmra.mrb[0].mxu0 %v3690_v23  ;;  %1876 = vmatpush1.bf16.msra.mxu1 %v3316_v22  ;;  %v3369_v22 = vld [vmem:[#allocation2 + $0x62c] ss:$16 sps:$4 sm:$0xff]  }
  0xe9   :  { %1907 = vmatprep.mubr.bf16.mxu1 %v3670_v36  ;;  %1877 = vmatprep.subr.bf16.mxu1 %v3321_v25  ;;  %v3421_v36 = vld [vmem:[#allocation4 + $0x30] ss:$8 sps:$4 sm:$0xff]  }
  0xea   :  { %2362 = vmatpush1.bf16.msra.mxu0 %v3412_v26  ;;  %v3367_v25 = vld [vmem:[#allocation2 + $0x628] ss:$16 sps:$4 sm:$0xff]   ;;  %v3372_v26 = vld [vmem:[#allocation2 + $0x64c] ss:$16 sps:$4 sm:$0xff]  }
  0xeb   :  { %2363 = vmatprep.subr.bf16.mxu0 %v3417_v29  ;;  %v3373_v29 = vld [vmem:[#allocation2 + $0x668] ss:$16 sps:$4 sm:$0xff]  }
  0xec   :  { %1878 = vmatpush1.bf16.msra.mxu1 %v3319_v28  ;;  %v3375_v28 = vld [vmem:[#allocation2 + $0x66c] ss:$16 sps:$4 sm:$0xff]  }
  0xed   :  { %1879 = vmatprep.subr.bf16.mxu1 %v3324_v8  ;;  %v3378_v8 = vld [vmem:[#allocation2 + $0x68c] ss:$16 sps:$4 sm:$0xff]  }
  0xee   :  { %2364 = vmatpush1.bf16.msra.mxu0 %v3415_v30  ;;  %v3376_v30 = vld [vmem:[#allocation2 + $0x688] ss:$16 sps:$4 sm:$0xff]  }
  0xef   :  { %2365 = vmatprep.subr.bf16.mxu0 %v3420_v31  ;;  %v3381_v31 = vld [vmem:[#allocation2 + $0x6ac] ss:$16 sps:$4 sm:$0xff]  }
  0xf0   :  { %1880 = vmatpush1.bf16.msra.mxu1 %v3322_v32  ;;  %v3384_v32 = vld [vmem:[#allocation2 + $0x6cc] ss:$16 sps:$4 sm:$0xff]  }
  0xf1   :  { %1881 = vmatprep.subr.bf16.mxu1 %v3327_v33  ;;  %v3456_v33 = vld [vmem:[#allocation4 + $0xe4] ss:$8 sps:$4 sm:$0xff]  }
  0xf2   :  { %2366 = vmatpush1.bf16.msra.mxu0 %v3418_v11  ;;  %v3454_v11 = vld [vmem:[#allocation4 + $0xe0] ss:$8 sps:$4 sm:$0xff]  }
  0xf3   :  { %2367 = vmatprep.subr.bf16.mxu0 %v3423_v52  ;;  %v3382_v52 = vld [vmem:[#allocation2 + $0x6c8] ss:$16 sps:$4 sm:$0xff]  }
  0xf4   :  { %1882 = vmatpush1.bf16.msra.mxu1 %v3325_v34 }
  0xf5   :  { %1883 = vmatprep.subr.bf16.mxu1 %v3330_v35 }
  0xf6   :  { %2368 = vmatpush1.bf16.msra.mxu0 %v3421_v36 }
  0xf7   :  { %2369 = vmatprep.subr.bf16.mxu0 %v3426_v37  ;;  %v3387_v37 = vld [vmem:[#allocation2 + $0x6ec] ss:$16 sps:$4 sm:$0xff]  }
  0xf8   :  { %1884 = vmatpush1.bf16.msra.mxu1 %v3328_v38  ;;  %v3459_v38 = vld [vmem:[#allocation4 + $0xf4] ss:$8 sps:$4 sm:$0xff]  }
  0xf9   :  { %1885 = vmatprep.subr.bf16.mxu1 %v3333_v39  ;;  %v3457_v39 = vld [vmem:[#allocation4 + $0xf0] ss:$8 sps:$4 sm:$0xff]  }
  0xfa   :  { %2370 = vmatpush1.bf16.msra.mxu0 %v3424_v40  ;;  %v3385_v40 = vld [vmem:[#allocation2 + $0x6e8] ss:$16 sps:$4 sm:$0xff]  }
  0xfb   :  { %2371 = vmatprep.subr.bf16.mxu0 %v3429_v41  ;;  %v3390_v41 = vld [vmem:[#allocation2 + $0x70c] ss:$16 sps:$4 sm:$0xff]  }
  0xfc   :  { %1886 = vmatpush1.bf16.msra.mxu1 %v3331_v42  ;;  %v3462_v42 = vld [vmem:[#allocation4 + $0x104] ss:$8 sps:$4 sm:$0xff]  }
  0xfd   :  { %1887 = vmatprep.subr.bf16.mxu1 %v3336_v43  ;;  %v3388_v43 = vld [vmem:[#allocation2 + $0x708] ss:$16 sps:$4 sm:$0xff]  }
  0xfe   :  { %2372 = vmatpush1.bf16.msra.mxu0 %v3427_v44  ;;  %v3393_v44 = vld [vmem:[#allocation2 + $0x72c] ss:$16 sps:$4 sm:$0xff]  }
  0xff   :  { %2373 = vmatprep.subr.bf16.mxu0 %v3432_v45  ;;  %v3391_v45 = vld [vmem:[#allocation2 + $0x728] ss:$16 sps:$4 sm:$0xff]  }
 0x100   :  { %1888 = vmatpush1.bf16.msra.mxu1 %v3334_v46  ;;  %v3396_v46 = vld [vmem:[#allocation2 + $0x74c] ss:$16 sps:$4 sm:$0xff]  }
 0x101   :  { %1889 = vmatprep.subr.bf16.mxu1 %v3339_v47  ;;  %v3394_v47 = vld [vmem:[#allocation2 + $0x748] ss:$16 sps:$4 sm:$0xff]  }
 0x102   :  { %2374 = vmatpush1.bf16.msra.mxu0 %v3430_v48  ;;  %v3399_v48 = vld [vmem:[#allocation2 + $0x76c] ss:$16 sps:$4 sm:$0xff]  }
 0x103   :  { %2375 = vmatprep.subr.bf16.mxu0 %v3435_v49  ;;  %v3397_v49 = vld [vmem:[#allocation2 + $0x768] ss:$16 sps:$4 sm:$0xff]  }
 0x104   :  { %1890 = vmatpush1.bf16.msra.mxu1 %v3337_v50  ;;  %v3402_v50 = vld [vmem:[#allocation2 + $0x78c] ss:$16 sps:$4 sm:$0xff]  }
 0x105   :  { %1891 = vmatprep.subr.bf16.mxu1 %v3342_v51  ;;  %v3400_v51 = vld [vmem:[#allocation2 + $0x788] ss:$16 sps:$4 sm:$0xff]  }
 0x106   :  { %2376 = vmatpush1.bf16.msra.mxu0 %v3433_v53  ;;  %v3405_v53 = vld [vmem:[#allocation2 + $0x7ac] ss:$16 sps:$4 sm:$0xff]  }
 0x107   :  { %2377 = vmatprep.subr.bf16.mxu0 %v3438_v54  ;;  %v3403_v54 = vld [vmem:[#allocation2 + $0x7a8] ss:$16 sps:$4 sm:$0xff]  }
 0x108   :  { %1892 = vmatpush1.bf16.msra.mxu1 %v3340_v55  ;;  %v3408_v55 = vld [vmem:[#allocation2 + $0x7cc] ss:$16 sps:$4 sm:$0xff]  }
 0x109   :  { %1893 = vmatprep.subr.bf16.mxu1 %v3345_v56  ;;  %v3406_v56 = vld [vmem:[#allocation2 + $0x7c8] ss:$16 sps:$4 sm:$0xff]  }
 0x10a   :  { %2378 = vmatpush1.bf16.msra.mxu0 %v3436_v57  ;;  %v3411_v57 = vld [vmem:[#allocation2 + $0x7ec] ss:$16 sps:$4 sm:$0xff]  }
 0x10b   :  { %2379 = vmatprep.subr.bf16.mxu0 %v3441_v58  ;;  %v3409_v58 = vld [vmem:[#allocation2 + $0x7e8] ss:$16 sps:$4 sm:$0xff]  }
 0x10c   :  { %1894 = vmatpush1.bf16.msra.mxu1 %v3343_v59  ;;  %v329_v59 = vlaneseq }
 0x10d   :  { %1895 = vmatprep.subr.bf16.mxu1 %v3348_v60 }
 0x10e   :  { %2380 = vmatpush1.bf16.msra.mxu0 %v3439_v61  ;;  %v3698_v60 = vshrl.u32 %v329_v59, 7 }
 0x10f   :  { %2381 = vmatprep.subr.bf16.mxu0 %v3444_v62  ;;  %v3704_v62 = vld [vmem:[%s3780_s2] sm:$0xf] }
 0x110   :  { %1896 = vmatpush1.bf16.msra.mxu1 %v3346_v63  ;;  %v331_v61 = vsub.s32 0, %v3698_v60  ;;  %v335_v63 = vsub.s32 1, %v3698_v60 }
 0x111   :  { %1897 = vmatprep.subr.bf16.mxu1 %v3351_v0 }
 0x112   :  { %2382 = vmatpush1.bf16.msra.mxu0 %v3442_v1  ;;  %v332_v0 = vrot.slane %v3704_v62, %v331_v61 }
 0x113   :  { %2383 = vmatprep.subr.bf16.mxu0 %v3447_v2 }
 0x114   :  { %1898 = vmatpush1.bf16.msra.mxu1 %v3349_v3 }
 0x115   :  { %1899 = vmatprep.subr.bf16.mxu1 %v3354_v4 }
 0x116   :  { %2384 = vmatpush1.bf16.msra.mxu0 %v3445_v5 }
 0x117   :  { %2385 = vmatprep.subr.bf16.mxu0 %v3450_v6 }
 0x118   :  { %1900 = vmatpush1.bf16.msra.mxu1 %v3352_v7 }
 0x119   :  { %1901 = vmatprep.subr.bf16.mxu1 %v3357_v9 }
 0x11a   :  { %2386 = vmatpush1.bf16.msra.mxu0 %v3448_v10 }
 0x11b   :  { %2387 = vmatprep.subr.bf16.mxu0 %v3453_v12 }
 0x11c   :  { %1902 = vmatpush1.bf16.msra.mxu1 %v3355_v13 }
 0x11d   :  { %1903 = vmatprep.subr.bf16.mxu1 %v3360_v14  ;;  %v3460_v14 = vld [vmem:[#allocation4 + $0x100] ss:$8 sps:$4 sm:$0xff]  }
 0x11e   :  { %2388 = vmatpush1.bf16.msra.mxu0 %v3451_v15 }
 0x11f   :  { %2389 = vmatprep.subr.bf16.mxu0 %v3456_v33  ;;  %v3472_v33 = vld [vmem:[#allocation4 + $0x140] ss:$8 sps:$4 sm:$0xff]  }
 0x120   :  { %1904 = vmatpush1.bf16.msra.mxu1 %v3358_v17  ;;  %v3465_v17 = vld [vmem:[#allocation4 + $0x114] ss:$8 sps:$4 sm:$0xff]  }
 0x121   :  { %1905 = vmatprep.subr.bf16.mxu1 %v3363_v18  ;;  %v3508_v18 = vld [vmem:[%s3783_s5 + $0x40] sm:$0xff]  }
 0x122   :  { %2390 = vmatpush1.bf16.msra.mxu0 %v3454_v11  ;;  %v3517_v11 = vld [vmem:[%s3783_s5 + $0x20] sm:$0xff]  }
 0x123   :  { %2391 = vmatprep.subr.bf16.mxu0 %v3459_v38  ;;  %v3483_v38 = vld [vmem:[#allocation4 + $0x174] ss:$8 sps:$4 sm:$0xff]  }
 0x124   :  { %1906 = vmatpush1.bf16.msra.mxu1 %v3361_v19  ;;  %v3509_v19 = vld [vmem:[%s3783_s5] sm:$0xff]  }
 0x125   :  { %1916 = vmatprep.subr.bf16.mxu1 %v3366_v20  ;;  %v3510_v20 = vld [vmem:[%s3783_s5 + $0x48] sm:$0xff]  }
 0x126   :  { %2392 = vmatpush1.bf16.msra.mxu0 %v3457_v39  ;;  %v3481_v39 = vld [vmem:[#allocation4 + $0x170] ss:$8 sps:$4 sm:$0xff]  }
 0x127   :  { %1908 = vmatmul.mubr.bf16.vlgmr.msra.gmra.mrb[4].mxu1 %v3676_v16  ;;  %v3379_v16 = vld [vmem:[#allocation2 + $0x6a8] ss:$16 sps:$4 sm:$0xff]   ;;  %2402 = vmatprep.subr.bf16.mxu0 %v3462_v42  ;;  %v3489_v42 = vld [vmem:[#allocation4 + $0x194] ss:$8 sps:$4 sm:$0xff]  }
 0x128   :  { %1917 = vmatpush1.bf16.msra.mxu1 %v3364_v21  ;;  %1948 = vmatprep.mubr.bf16.mxu1 %v3683_v24  ;;  %v3463_v21 = vld [vmem:[#allocation4 + $0x110] ss:$8 sps:$4 sm:$0xff]  }
 0x129   :  { %1918 = vmatprep.subr.bf16.mxu1 %v3369_v22  ;;  %v3468_v22 = vld [vmem:[#allocation4 + $0x124] ss:$8 sps:$4 sm:$0xff]  }
 0x12c   :  { %1919 = vmatpush1.bf16.msra.mxu1 %v3367_v25  ;;  %v3511_v25 = vld [vmem:[%s3783_s5 + $0x8] sm:$0xff]  }
 0x12d   :  { %1920 = vmatprep.subr.bf16.mxu1 %v3372_v26  ;;  %v3512_v26 = vld [vmem:[%s3783_s5 + $0x50] sm:$0xff]  }
 0x130   :  { %1921 = vmatpush1.bf16.msra.mxu1 %v3370_v27  ;;  %v3466_v27 = vld [vmem:[#allocation4 + $0x120] ss:$8 sps:$4 sm:$0xff]  }
 0x131   :  { %1922 = vmatprep.subr.bf16.mxu1 %v3375_v28  ;;  %v3471_v28 = vld [vmem:[#allocation4 + $0x134] ss:$8 sps:$4 sm:$0xff]  }
 0x134   :  { %1923 = vmatpush1.bf16.msra.mxu1 %v3373_v29  ;;  %v3513_v29 = vld [vmem:[%s3783_s5 + $0x10] sm:$0xff]  }
 0x135   :  { %1924 = vmatprep.subr.bf16.mxu1 %v3378_v8  ;;  %v3514_v8 = vld [vmem:[%s3783_s5 + $0x58] sm:$0xff]  }
 0x138   :  { %1925 = vmatpush1.bf16.msra.mxu1 %v3376_v30  ;;  %v3469_v30 = vld [vmem:[#allocation4 + $0x130] ss:$8 sps:$4 sm:$0xff]  }
 0x139   :  { %1926 = vmatprep.subr.bf16.mxu1 %v3381_v31  ;;  %v3474_v31 = vld [vmem:[#allocation4 + $0x144] ss:$8 sps:$4 sm:$0xff]  }
 0x13a   :  { %v1663_v24 = vpop.f32.mrb[0].mxu1 }
 0x13b   :  { %v1665_v34 = vpop.f32.mrb[1].mxu1  ;;  %v1664_v1 = vadd.f32 %v1663_v24, %v332_v0  ;;  %v3477_v24 = vld [vmem:[#allocation4 + $0x154] ss:$8 sps:$4 sm:$0xff]  }
 0x13c   :  { %v1667_v35 = vpop.f32.mrb[2].mxu1  ;;  %1927 = vmatpush1.bf16.msra.mxu1 %v3379_v16  ;;  %v3515_v16 = vld [vmem:[%s3783_s5 + $0x18] sm:$0xff]  }
 0x13d   :  { %v1668_v36 = vpop.f32.mrb[3].mxu1  ;;  %1928 = vmatprep.subr.bf16.mxu1 %v3384_v32  ;;  %v3516_v32 = vld [vmem:[%s3783_s5 + $0x60] sm:$0xff]   ;;  %v3475_v35 = vld [vmem:[#allocation4 + $0x150] ss:$8 sps:$4 sm:$0xff]  }
 0x13e   :  { %v3519_v36 = vld [vmem:[%s3783_s5 + $0x28] sm:$0xff]  }
 0x140   :  { %1929 = vmatpush1.bf16.msra.mxu1 %v3382_v52  ;;  %v3480_v52 = vld [vmem:[#allocation4 + $0x164] ss:$8 sps:$4 sm:$0xff]  }
 0x141   :  { %1930 = vmatprep.subr.bf16.mxu1 %v3387_v37  ;;  %v3478_v37 = vld [vmem:[#allocation4 + $0x160] ss:$8 sps:$4 sm:$0xff]  }
 0x144   :  { %1931 = vmatpush1.bf16.msra.mxu1 %v3385_v40  ;;  %v3486_v40 = vld [vmem:[#allocation4 + $0x184] ss:$8 sps:$4 sm:$0xff]  }
 0x145   :  { %1932 = vmatprep.subr.bf16.mxu1 %v3390_v41  ;;  %v3484_v41 = vld [vmem:[#allocation4 + $0x180] ss:$8 sps:$4 sm:$0xff]  }
 0x148   :  { %1933 = vmatpush1.bf16.msra.mxu1 %v3388_v43  ;;  %v3487_v43 = vld [vmem:[#allocation4 + $0x190] ss:$8 sps:$4 sm:$0xff]  }
 0x149   :  { %1934 = vmatprep.subr.bf16.mxu1 %v3393_v44  ;;  %v3492_v44 = vld [vmem:[#allocation4 + $0x1a4] ss:$8 sps:$4 sm:$0xff]  }
 0x14c   :  { %1935 = vmatpush1.bf16.msra.mxu1 %v3391_v45  ;;  %v3490_v45 = vld [vmem:[#allocation4 + $0x1a0] ss:$8 sps:$4 sm:$0xff]  }
 0x14d   :  { %1936 = vmatprep.subr.bf16.mxu1 %v3396_v46  ;;  %v3495_v46 = vld [vmem:[#allocation4 + $0x1b4] ss:$8 sps:$4 sm:$0xff]  }
 0x150   :  { %1937 = vmatpush1.bf16.msra.mxu1 %v3394_v47  ;;  %v3493_v47 = vld [vmem:[#allocation4 + $0x1b0] ss:$8 sps:$4 sm:$0xff]  }
 0x151   :  { %1938 = vmatprep.subr.bf16.mxu1 %v3399_v48  ;;  %v3498_v48 = vld [vmem:[#allocation4 + $0x1c4] ss:$8 sps:$4 sm:$0xff]  }
 0x154   :  { %1939 = vmatpush1.bf16.msra.mxu1 %v3397_v49  ;;  %v3496_v49 = vld [vmem:[#allocation4 + $0x1c0] ss:$8 sps:$4 sm:$0xff]  }
 0x155   :  { %1940 = vmatprep.subr.bf16.mxu1 %v3402_v50  ;;  %v3501_v50 = vld [vmem:[#allocation4 + $0x1d4] ss:$8 sps:$4 sm:$0xff]  }
 0x158   :  { %1941 = vmatpush1.bf16.msra.mxu1 %v3400_v51  ;;  %v3499_v51 = vld [vmem:[#allocation4 + $0x1d0] ss:$8 sps:$4 sm:$0xff]  }
 0x159   :  { %1942 = vmatprep.subr.bf16.mxu1 %v3405_v53  ;;  %v3504_v53 = vld [vmem:[#allocation4 + $0x1e4] ss:$8 sps:$4 sm:$0xff]  }
 0x15c   :  { %1943 = vmatpush1.bf16.msra.mxu1 %v3403_v54  ;;  %v3502_v54 = vld [vmem:[#allocation4 + $0x1e0] ss:$8 sps:$4 sm:$0xff]  }
 0x15d   :  { %1944 = vmatprep.subr.bf16.mxu1 %v3408_v55  ;;  %v3507_v55 = vld [vmem:[#allocation4 + $0x1f4] ss:$8 sps:$4 sm:$0xff]  }
 0x160   :  { %1945 = vmatpush1.bf16.msra.mxu1 %v3406_v56  ;;  %v3505_v56 = vld [vmem:[#allocation4 + $0x1f0] ss:$8 sps:$4 sm:$0xff]  }
 0x161   :  { %1946 = vmatprep.subr.bf16.mxu1 %v3411_v57  ;;  %v339_v57 = vsub.s32 2, %v3698_v60 }
 0x163   :  { %v340_v59 = vrot.slane %v3704_v62, %v339_v57 }
 0x164   :  { %1947 = vmatpush1.bf16.msra.mxu1 %v3409_v58  ;;  %v343_v58 = vsub.s32 3, %v3698_v60 }
 0x165   :  { %2968 = vmatprep.subr.bf16.mxu1 %v3508_v18 }
 0x166   :  { %v344_v0 = vrot.slane %v3704_v62, %v343_v58 }
 0x167   :  { %1949 = vmatmul.mubr.bf16.vlgmr.msra.gmra.mrb[4].mxu1 %v3690_v23  ;;  %v336_v23 = vrot.slane %v3704_v62, %v335_v63  ;;  %v3521_v62 = vld [vmem:[%s3783_s5 + $0x30] sm:$0xff]  }
 0x168   :  { %2969 = vmatpush3.bf16.msra.mxu1 %v3509_v19 }
 0x169   :  { %v1666_v2 = vadd.f32 %v1665_v34, %v336_v23  ;;  %2970 = vmatprep.subr.bf16.mxu1 %v3510_v20  ;;  %v3518_v34 = vld [vmem:[%s3783_s5 + $0x68] sm:$0xff]  }
 0x16c   :  { %2971 = vmatpush3.bf16.msra.mxu1 %v3511_v25 }
 0x16d   :  { %2972 = vmatprep.subr.bf16.mxu1 %v3512_v26 }
 0x170   :  { %2973 = vmatpush3.bf16.msra.mxu1 %v3513_v29 }
 0x171   :  { %2974 = vmatprep.subr.bf16.mxu1 %v3514_v8 }
 0x174   :  { %2975 = vmatpush3.bf16.msra.mxu1 %v3515_v16 }
 0x175   :  { %2976 = vmatprep.subr.bf16.mxu1 %v3516_v32 }
 0x178   :  { %2977 = vmatpush3.bf16.msra.mxu1 %v3517_v11 }
 0x179   :  { %2978 = vmatprep.subr.bf16.mxu1 %v3518_v34 }
 0x17c   :  { %2979 = vmatpush3.bf16.msra.mxu1 %v3519_v36 }
 0x1bb   :  { %v1786_v3 = vpop.f32.mrb[0].mxu0 }
 0x1bc   :  { %v2991_v4 = vadd.f32 %v1786_v3, %v1664_v1  ;;  %v1788_v5 = vpop.f32.mrb[1].mxu0 }
 0x1bd   :  { %v2993_v6 = vadd.f32 %v1788_v5, %v1666_v2  ;;  %v1790_v7 = vpop.f32.mrb[2].mxu0 }
 0x1be   :  { %v1957_v9 = vmax.f32 %v2991_v4, 0.0  ;;  %v1791_v10 = vpop.f32.mrb[3].mxu0 }
 0x1bf   :  { %v1958_v12 = vmax.f32 %v2993_v6, 0.0 }
 0x1c0   :  { %v1961_v15 = vpack.c.bf16 %v1957_v9, %v1957_v9 }
 0x1c1   :  { %v1962_v13 = vpack.c.bf16 %v1958_v12, %v1958_v12  ;;  %v3520_v12 = vld [vmem:[%s3783_s5 + $0x70] sm:$0xff]  }
 0x1c2   :  { %2980 = vmatprep.subr.bf16.mxu1 %v3520_v12 }
 0x1c3   :  { %2393 = vmatprep.mubr.bf16.mxu0 %v1962_v13  ;;  %2981 = vmatpush3.bf16.msra.mxu1 %v3521_v62  ;;  %v3522_v13 = vld [vmem:[%s3783_s5 + $0x78] sm:$0xff]  }
 0x1c4   :  { %2394 = vmatmul.mubr.bf16.vlgmr.msra.gmra.mrb[4].mxu0 %v1961_v15  ;;  %2982 = vmatprep.subr.bf16.mxu1 %v3522_v13  ;;  %v2029_v15 = vld [vmem:[%s3782_s4] sm:$0x3] }
 0x1c5   :  { %2403 = vmatpush1.bf16.msra.mxu0 %v3460_v14  ;;  %v3523_v14 = vld [vmem:[%s3783_s5 + $0x38] sm:$0xff]   ;;  %v2038_v18 = vrot.slane %v2029_v15, %v335_v63 }
 0x1c6   :  { %2404 = vmatprep.subr.bf16.mxu0 %v3465_v17  ;;  %v2034_v17 = vrot.slane %v2029_v15, %v331_v61  ;;  %v2951_v61 = vld [vmem:[%s3784_s6] ss:$0 sm:$0xff] }
 0x1c7   :  { %2983 = vmatpush3.bf16.msra.mxu1 %v3523_v14 }
 0x1c9   :  { %2405 = vmatpush1.bf16.msra.mxu0 %v3463_v21 }
 0x1ca   :  { %2406 = vmatprep.subr.bf16.mxu0 %v3468_v22 }
 0x1cd   :  { %2407 = vmatpush1.bf16.msra.mxu0 %v3466_v27 }
 0x1ce   :  { %2408 = vmatprep.subr.bf16.mxu0 %v3471_v28 }
 0x1d1   :  { %2409 = vmatpush1.bf16.msra.mxu0 %v3469_v30 }
 0x1d2   :  { %2410 = vmatprep.subr.bf16.mxu0 %v3474_v31 }
 0x1d5   :  { %2411 = vmatpush1.bf16.msra.mxu0 %v3472_v33 }
 0x1d6   :  { %2412 = vmatprep.subr.bf16.mxu0 %v3477_v24 }
 0x1d9   :  { %2413 = vmatpush1.bf16.msra.mxu0 %v3475_v35 }
 0x1da   :  { %2414 = vmatprep.subr.bf16.mxu0 %v3480_v52 }
 0x1dd   :  { %2415 = vmatpush1.bf16.msra.mxu0 %v3478_v37 }
 0x1de   :  { %2416 = vmatprep.subr.bf16.mxu0 %v3483_v38 }
 0x1e1   :  { %2417 = vmatpush1.bf16.msra.mxu0 %v3481_v39 }
 0x1e2   :  { %2418 = vmatprep.subr.bf16.mxu0 %v3486_v40 }
 0x1e5   :  { %2419 = vmatpush1.bf16.msra.mxu0 %v3484_v41 }
 0x1e6   :  { %2420 = vmatprep.subr.bf16.mxu0 %v3489_v42 }
 0x1e9   :  { %2421 = vmatpush1.bf16.msra.mxu0 %v3487_v43 }
 0x1ea   :  { %2422 = vmatprep.subr.bf16.mxu0 %v3492_v44 }
 0x1ed   :  { %2423 = vmatpush1.bf16.msra.mxu0 %v3490_v45 }
 0x1ee   :  { %2424 = vmatprep.subr.bf16.mxu0 %v3495_v46 }
 0x1f1   :  { %2425 = vmatpush1.bf16.msra.mxu0 %v3493_v47 }
 0x1f2   :  { %2426 = vmatprep.subr.bf16.mxu0 %v3498_v48 }
 0x1f5   :  { %2427 = vmatpush1.bf16.msra.mxu0 %v3496_v49 }
 0x1f6   :  { %2428 = vmatprep.subr.bf16.mxu0 %v3501_v50 }
 0x1f9   :  { %2429 = vmatpush1.bf16.msra.mxu0 %v3499_v51 }
 0x1fa   :  { %2430 = vmatprep.subr.bf16.mxu0 %v3504_v53 }
 0x1fd   :  { %2431 = vmatpush1.bf16.msra.mxu0 %v3502_v54 }
 0x1fe   :  { %2432 = vmatprep.subr.bf16.mxu0 %v3507_v55 }
 0x201   :  { %2433 = vmatpush1.bf16.msra.mxu0 %v3505_v56 }
 0x23a   :  { %v1950_v23 = vpop.f32.mrb[4].mxu1 }
 0x23b   :  { %v2994_v1 = vadd.f32 %v1950_v23, %v340_v59  ;;  %v1952_v2 = vpop.f32.mrb[5].mxu1 }
 0x23c   :  { %v2995_v3 = vadd.f32 %v1952_v2, %v344_v0  ;;  %v1954_v4 = vpop.f32.mrb[6].mxu1 }
 0x23d   :  { %v1959_v5 = vmax.f32 %v2994_v1, 0.0  ;;  %v1955_v6 = vpop.f32.mrb[7].mxu1 }
 0x23e   :  { %v1960_v7 = vmax.f32 %v2995_v3, 0.0 }
 0x23f   :  { %v1963_v10 = vpack.c.bf16 %v1959_v5, %v1959_v5 }
 0x240   :  { %v1964_v9 = vpack.c.bf16 %v1960_v7, %v1960_v7 }
 0x242   :  { %2434 = vmatprep.mubr.bf16.mxu0 %v1964_v9 }
 0x243   :  { %2435 = vmatmul.mubr.bf16.vlgmr.msra.gmra.mrb[4].mxu0 %v1963_v10 }
 0x316   :  { %v2436_v19 = vpop.f32.mrb[4].mxu0 }
 0x317   :  { %v2996_v20 = vadd.f32 %v2436_v19, %v2034_v17  ;;  %v2438_v21 = vpop.f32.mrb[5].mxu0 }
 0x318   :  { %v2997_v22 = vadd.f32 %v2438_v21, %v2038_v18  ;;  %v2440_v25 = vpop.f32.mrb[6].mxu0 }
 0x319   :  { %v2443_v26 = vmax.f32 %v2996_v20, 0.0  ;;  %v2441_v27 = vpop.f32.mrb[7].mxu0 }
 0x31a   :  { %v2444_v28 = vmax.f32 %v2997_v22, 0.0 }
 0x31b   :  { %v2445_v8 = vpack.c.bf16 %v2443_v26, %v2443_v26 }
 0x31c   :  { %v2446_v29 = vpack.c.bf16 %v2444_v28, %v2444_v28 }
 0x31e   :  { %2614 = vmatprep.mubr.bf16.mxu1 %v2446_v29 }
 0x31f   :  { %2615 = vmatmul.mubr.bf16.vlgmr.msra.gmra.mrb[8].mxu1 %v2445_v8 }
 0x3f2   :  { %v2984_v30 = vpop.f32.mrb[8].mxu1 }
 0x3f3   :  { %v2985_v31 = vpop.f32.mrb[9].mxu1 }
 0x3f4   :  { %v2986_v60 = vadd.f32 %v2985_v31, %v2984_v30  ;;  %v2987_v63 = vpop.f32.mrb[10].mxu1 }
 0x3f5   :  { %v2988_v16 = vpop.f32.mrb[11].mxu1 }
 0x3f6   :  { %v2617_v32 = vadd.f32 %v2986_v60, %v2951_v61 }
 0x3f8   :  { %v2622_v33 = vmax.f32 %v2617_v32, 0.0 }
 0x3fa   :  { %2624 = vst.msk [vmem:[%s3785_s7] sm:$0xff] %vm2623_vm0, %v2622_v33 }
 0x3fb   :  { %2629 = vsyncpa [#allocation3], 1 }
 0x3fc   :  { %2630 = vsyncpa [#allocation5], 1 }

</bundles_post_ra>
